<compile_context>
chip_gen: v7x
topology: tpu7x:2x2x1
jax: 0.10.0
libtpu: 0.0.40
codegen_flags: <defaults>
</compile_context>

<pallas_src>
import functools
import math

import jax
import jax.numpy as jnp
from jax.experimental import pallas as pl
from jax.experimental.pallas import tpu as pltpu


def _round_up(n, m):
    return ((n + m - 1) // m) * m


def _fourier_kan_kernel(xt_ref, w_ref, b_ref, o_ref, *, gridsize):
    # xt_ref: (Fp, TB) f32   current batch tile, transposed (batch on lanes)
    # w_ref : (2*G*Fp, F*E) bf16  block-diagonal Fourier coefficients (resident)
    # b_ref : (1, F*E) f32   bias row (resident)
    # o_ref : (TB, F*E)      lane-dense output tile
    xt = xt_ref[...]                       # (Fp, TB), lane-dense over batch

    # Base pair: the only transcendental evaluations in the kernel.
    c1 = jnp.cos(xt)
    s1 = jnp.sin(xt)

    # Angle-addition (Chebyshev) recurrence, fully lane-dense:
    #   cos((k+1)x) = cos(kx) cos(x) - sin(kx) sin(x)
    #   sin((k+1)x) = sin(kx) cos(x) + cos(kx) sin(x)
    cos_blocks = [c1]
    sin_blocks = [s1]
    ck, sk = c1, s1
    for _ in range(gridsize - 1):
        ck, sk = ck * c1 - sk * s1, sk * c1 + ck * s1
        cos_blocks.append(ck)
        sin_blocks.append(sk)

    # Sublane concatenate (vreg copies, no lane shuffles): (2*G*Fp, TB).
    # Row t*Fp + f: t < G -> cos for k=t+1; t >= G -> sin for k=t-G+1.
    featsT = jnp.concatenate(cos_blocks + sin_blocks, axis=0)

    # One f32 XLU transpose back to matmul orientation, then cast to bf16 for a
    # single-pass MXU contraction with f32 accumulation.
    feats = featsT.T.astype(jnp.bfloat16)                      # (TB, 2*G*Fp)
    out = jnp.dot(feats, w_ref[...],
                  preferred_element_type=jnp.float32)          # (TB, F*E) f32

    o_ref[...] = (out + b_ref[...]).astype(o_ref.dtype)


def fourier_kan_forward(x, fourier_coeffs, bias=None, *,
                        block_batch=1024, out_dtype=jnp.float32):
    """x: (B, F), fourier_coeffs: (2, F, E, G), bias: (1, F, E) or None
    -> y: (B, F, E) in `out_dtype`.

    block_batch: batch tile (multiple of 128). Default 1024; sweep 1024-4096 on
    v5e/v6e (128 MiB VMEM); on v7x (64 MiB VMEM) keep it <= ~2048 for F*E=512
    and prefer a grid with >= 2 tiles so both TensorCores are used.
    """
    B, F = x.shape
    two, F2, E, G = fourier_coeffs.shape
    assert two == 2 and F2 == F, \
        "fourier_coeffs must be (2, n_features, d_embedding, gridsize)"
    assert block_batch % 128 == 0, "block_batch must be a multiple of 128"

    Fp = _round_up(F, 8)        # padded feature count (sublane granularity)
    K = 2 * G * Fp              # contraction depth (== 256 at F=16, G=8)
    N = F * E                   # lane-dense output width

    x = x.astype(jnp.float32)
    coeffs = fourier_coeffs.astype(jnp.float32)

    # ---- One-time parameter repack (plain XLA, outside the kernel) ---------
    # W_bd[t*Fp + f', f*E + e] = delta(f', f) * coeff_t[f, e]   with
    #   t in [0, G)  -> cos coefficient for k = t + 1
    #   t in [G, 2G) -> sin coefficient for k = t - G + 1
    # Padded feature rows (f' >= F) are zero. Cast to bf16 (MXU-native).
    w_tfe = jnp.concatenate(
        [jnp.transpose(coeffs[0], (2, 0, 1)),   # (G, F, E) cos, index [k-1,f,e]
         jnp.transpose(coeffs[1], (2, 0, 1))],  # (G, F, E) sin
        axis=0)                                  # (2G, F, E)
    eye_pad = jnp.eye(Fp, F, dtype=jnp.float32)  # (Fp, F)
    w_bd = (eye_pad[None, :, :, None] * w_tfe[:, None, :, :]).reshape(K, N)
    w_bd = w_bd.astype(jnp.bfloat16)
    # Note: W_bd memory scales as F^2; for large n_features add a feature grid
    # axis (tile f) so each step contracts (TB, 2G*Fb) @ (2G*Fb, Fb*E).

    if bias is None:
        bias_row = jnp.zeros((1, N), jnp.float32)
    else:
        bias_row = bias.astype(jnp.float32).reshape(1, N)

    # ---- Batch tiling (batch goes on the lane axis of the transposed x) ----
    tb = min(block_batch, _round_up(B, 128))
    bp = _round_up(B, tb)
    num_tiles = bp // tb

    # Transposed + padded input: (Fp, bp). Padded entries are zero; they only
    # ever multiply zero weight rows / get sliced off, so they are harmless.
    xt = jnp.pad(x.T, ((0, Fp - F), (0, bp - B)))

    kernel = functools.partial(_fourier_kan_kernel, gridsize=G)

    flops = 2 * bp * K * N + bp * N
    transcendentals = 2 * bp * Fp
    bytes_accessed = (4 * bp * Fp + 2 * K * N + 4 * N
                      + bp * N * jnp.dtype(out_dtype).itemsize)

    def _run(single_buffer_resident):
        if single_buffer_resident:
            w_spec = pl.BlockSpec((K, N), lambda i: (0, 0),
                                  pipeline_mode=pl.Buffered(1))
            b_spec = pl.BlockSpec((1, N), lambda i: (0, 0),
                                  pipeline_mode=pl.Buffered(1))
        else:
            w_spec = pl.BlockSpec((K, N), lambda i: (0, 0))
            b_spec = pl.BlockSpec((1, N), lambda i: (0, 0))
        return pl.pallas_call(
            kernel,
            out_shape=jax.ShapeDtypeStruct((bp, N), out_dtype),
            grid_spec=pltpu.PrefetchScalarGridSpec(
                num_scalar_prefetch=0,
                grid=(num_tiles,),
                in_specs=[
                    pl.BlockSpec((Fp, tb), lambda i: (0, i)),  # batch tile (T)
                    w_spec,                                    # resident weights
                    b_spec,                                    # resident bias
                ],
                out_specs=pl.BlockSpec((tb, N), lambda i: (i, 0)),  # lane-dense
            ),
            compiler_params=pltpu.CompilerParams(
                dimension_semantics=("parallel",),   # megacore-shard batch tiles
                vmem_limit_bytes=48 * 1024 * 1024,   # <= v7x's 64 MiB physical
            ),
            cost_estimate=pl.CostEstimate(
                flops=flops,
                transcendentals=transcendentals,
                bytes_accessed=bytes_accessed,
            ),
        )(xt, w_bd, bias_row)

    try:
        out_flat = _run(True)
    except Exception:
        # Fallback for JAX builds that reject BlockSpec(pipeline_mode=...);
        # only costs the (small) double-buffering of the resident operands.
        out_flat = _run(False)

    return out_flat[:B].reshape(B, F, E)


def fourier_kan_reference(x, fourier_coeffs, bias=None):
    """Direct JAX transcription of the PyTorch forward (f32, no matmul)."""
    _, _, _, G = fourier_coeffs.shape
    k = jnp.arange(1, G + 1, dtype=x.dtype)                      # (G,)
    kx = x[:, :, None, None] * k                                 # (B, F, 1, G)
    y = (jnp.sum(jnp.cos(kx) * fourier_coeffs[0:1], axis=-1)
         + jnp.sum(jnp.sin(kx) * fourier_coeffs[1:2], axis=-1))  # (B, F, E)
    if bias is not None:
        y = y + bias
    return y


if __name__ == "__main__":
    # Module hyperparameters (NaiveFourierKANLayer, smooth_initialization=False).
    n_features = 16
    d_embedding = 32
    gridsize = 8
    batch = 300            # not a multiple of the tile -> exercises padding

    key = jax.random.PRNGKey(0)
    kx, kc, kb = jax.random.split(key, 3)

    x = jax.random.normal(kx, (batch, n_features), dtype=jnp.float32)
    # Matches torch.randn(2, F, E, G) / (sqrt(F) * sqrt(G)).
    fourier_coeffs = (
        jax.random.normal(kc, (2, n_features, d_embedding, gridsize),
                          dtype=jnp.float32)
        / (math.sqrt(n_features) * math.sqrt(gridsize)))
    # The module initializes bias to zeros; use a small non-zero bias here so
    # the bias-add path is actually exercised by the correctness check.
    bias = 0.1 * jax.random.normal(kb, (1, n_features, d_embedding),
                                   dtype=jnp.float32)

    # Small block_batch so the test runs several pipelined grid steps (3 tiles).
    out = fourier_kan_forward(x, fourier_coeffs, bias, block_batch=128)
    out = jax.block_until_ready(out)

    ref = fourier_kan_reference(x, fourier_coeffs, bias)
    assert out.shape == (batch, n_features, d_embedding)
    # bf16 MXU operands (f32 accumulation): per-output error budget is a sum of
    # 2*G bf16-rounded products of magnitude ~1/sqrt(F*G) -> a few 1e-3 worst
    # case; 5e-3 still catches any layout / indexing / recurrence bug (those
    # produce O(0.1-1) errors).
    max_err = float(jnp.max(jnp.abs(out - ref)))
    assert jnp.allclose(out, ref, atol=5e-3, rtol=5e-3), f"max abs err = {max_err}"

    print("KERNEL_OK")
</pallas_src>

<mosaic_0001>
module attributes {stable_mosaic.version = 11 : i64} {
  func.func @_fourier_kan_kernel(%arg0: i32, %arg1: memref<16x128xf32, #tpu.memory_space<vmem>>, %arg2: memref<256x512xbf16, #tpu.memory_space<vmem>>, %arg3: memref<1x512xf32, #tpu.memory_space<vmem>>, %arg4: memref<128x512xf32, #tpu.memory_space<vmem>>) attributes {dimension_semantics = [#tpu.dimension_semantics<parallel>], iteration_bounds = array<i64: 3>, scalar_prefetch = 0 : i64, scratch_operands = 0 : i64, tpu.core_type = #tpu.core_type<tc>, window_params = [{transform_indices = @transform_0, window_bounds = array<i64: 16, 128>}, {pipeline_mode = #tpu.pipeline_mode<synchronous>, transform_indices = @transform_1, window_bounds = array<i64: 256, 512>}, {pipeline_mode = #tpu.pipeline_mode<synchronous>, transform_indices = @transform_2, window_bounds = array<i64: 1, 512>}, {transform_indices = @transform_3, window_bounds = array<i64: 128, 512>}]} {
    %c0 = arith.constant 0 : index
    %c0_0 = arith.constant 0 : index
    %0 = vector.load %arg1[%c0, %c0_0] : memref<16x128xf32, #tpu.memory_space<vmem>>, vector<16x128xf32>
    %1 = math.cos %0 : vector<16x128xf32>
    %2 = math.sin %0 : vector<16x128xf32>
    %3 = arith.mulf %1, %1 : vector<16x128xf32>
    %4 = arith.mulf %2, %2 : vector<16x128xf32>
    %5 = arith.subf %3, %4 : vector<16x128xf32>
    %6 = arith.mulf %2, %1 : vector<16x128xf32>
    %7 = arith.mulf %1, %2 : vector<16x128xf32>
    %8 = arith.addf %6, %7 : vector<16x128xf32>
    %9 = arith.mulf %5, %1 : vector<16x128xf32>
    %10 = arith.mulf %8, %2 : vector<16x128xf32>
    %11 = arith.subf %9, %10 : vector<16x128xf32>
    %12 = arith.mulf %8, %1 : vector<16x128xf32>
    %13 = arith.mulf %5, %2 : vector<16x128xf32>
    %14 = arith.addf %12, %13 : vector<16x128xf32>
    %15 = arith.mulf %11, %1 : vector<16x128xf32>
    %16 = arith.mulf %14, %2 : vector<16x128xf32>
    %17 = arith.subf %15, %16 : vector<16x128xf32>
    %18 = arith.mulf %14, %1 : vector<16x128xf32>
    %19 = arith.mulf %11, %2 : vector<16x128xf32>
    %20 = arith.addf %18, %19 : vector<16x128xf32>
    %21 = arith.mulf %17, %1 : vector<16x128xf32>
    %22 = arith.mulf %20, %2 : vector<16x128xf32>
    %23 = arith.subf %21, %22 : vector<16x128xf32>
    %24 = arith.mulf %20, %1 : vector<16x128xf32>
    %25 = arith.mulf %17, %2 : vector<16x128xf32>
    %26 = arith.addf %24, %25 : vector<16x128xf32>
    %27 = arith.mulf %23, %1 : vector<16x128xf32>
    %28 = arith.mulf %26, %2 : vector<16x128xf32>
    %29 = arith.subf %27, %28 : vector<16x128xf32>
    %30 = arith.mulf %26, %1 : vector<16x128xf32>
    %31 = arith.mulf %23, %2 : vector<16x128xf32>
    %32 = arith.addf %30, %31 : vector<16x128xf32>
    %33 = arith.mulf %29, %1 : vector<16x128xf32>
    %34 = arith.mulf %32, %2 : vector<16x128xf32>
    %35 = arith.subf %33, %34 : vector<16x128xf32>
    %36 = arith.mulf %32, %1 : vector<16x128xf32>
    %37 = arith.mulf %29, %2 : vector<16x128xf32>
    %38 = arith.addf %36, %37 : vector<16x128xf32>
    %39 = arith.mulf %35, %1 : vector<16x128xf32>
    %40 = arith.mulf %38, %2 : vector<16x128xf32>
    %41 = arith.subf %39, %40 : vector<16x128xf32>
    %42 = arith.mulf %38, %1 : vector<16x128xf32>
    %43 = arith.mulf %35, %2 : vector<16x128xf32>
    %44 = arith.addf %42, %43 : vector<16x128xf32>
    %45 = tpu.concatenate %1, %5, %11, %17, %23, %29, %35, %41, %2, %8, %14, %20, %26, %32, %38, %44 in 0 : vector<16x128xf32>, vector<16x128xf32>, vector<16x128xf32>, vector<16x128xf32>, vector<16x128xf32>, vector<16x128xf32>, vector<16x128xf32>, vector<16x128xf32>, vector<16x128xf32>, vector<16x128xf32>, vector<16x128xf32>, vector<16x128xf32>, vector<16x128xf32>, vector<16x128xf32>, vector<16x128xf32>, vector<16x128xf32> -> vector<256x128xf32>
    %46 = tpu.transpose %45, [1, 0] : vector<256x128xf32> -> vector<128x256xf32>
    %47 = arith.truncf %46 : vector<128x256xf32> to vector<128x256xbf16>
    %c0_1 = arith.constant 0 : index
    %c0_2 = arith.constant 0 : index
    %48 = vector.load %arg2[%c0_1, %c0_2] : memref<256x512xbf16, #tpu.memory_space<vmem>>, vector<256x512xbf16>
    %cst = arith.constant dense<0.000000e+00> : vector<128x512xf32>
    %49 = tpu.matmul %47, %48, %cst {dimension_numbers = #tpu.dot_dimension_numbers<[1], [0], [0], [1], [0, 0, 1, 1], [], []>} : vector<128x256xbf16>, vector<256x512xbf16>, vector<128x512xf32> -> vector<128x512xf32>
    %c0_3 = arith.constant 0 : index
    %c0_4 = arith.constant 0 : index
    %50 = vector.load %arg3[%c0_3, %c0_4] : memref<1x512xf32, #tpu.memory_space<vmem>>, vector<1x512xf32>
    %51 = vector.broadcast %50 : vector<1x512xf32> to vector<128x512xf32>
    %52 = arith.addf %49, %51 : vector<128x512xf32>
    %c0_5 = arith.constant 0 : index
    %c0_6 = arith.constant 0 : index
    %53 = vector.load %arg4[%c0_5, %c0_6] : memref<128x512xf32, #tpu.memory_space<vmem>>, vector<128x512xf32>
    tpu.vector_store %arg4[%c0_5, %c0_6], %52 {strides = array<i32>} : memref<128x512xf32, #tpu.memory_space<vmem>>, vector<128x512xf32>,
    return
  }
  func.func @transform_0(%arg0: i32) -> (i32, i32) {
    %c0_i32 = arith.constant 0 : i32
    %c0_i32_0 = arith.constant 0 : i32
    return %c0_i32, %arg0 : i32, i32
  }
  func.func @transform_1(%arg0: i32) -> (i32, i32) {
    %c0_i32 = arith.constant 0 : i32
    %c0_i32_0 = arith.constant 0 : i32
    %c0_i32_1 = arith.constant 0 : i32
    return %c0_i32, %c0_i32_0 : i32, i32
  }
  func.func @transform_2(%arg0: i32) -> (i32, i32) {
    %c0_i32 = arith.constant 0 : i32
    %c0_i32_0 = arith.constant 0 : i32
    %c0_i32_1 = arith.constant 0 : i32
    return %c0_i32, %c0_i32_0 : i32, i32
  }
  func.func @transform_3(%arg0: i32) -> (i32, i32) {
    %c0_i32 = arith.constant 0 : i32
    %c0_i32_0 = arith.constant 0 : i32
    return %arg0, %c0_i32 : i32, i32
  }
}

module attributes {stable_mosaic.version = 11 : i64} {
  func.func @_fourier_kan_kernel(%arg0: i32, %arg1: memref<16x128xf32, #tpu.memory_space<vmem>>, %arg2: memref<256x512xbf16, #tpu.memory_space<vmem>>, %arg3: memref<1x512xf32, #tpu.memory_space<vmem>>, %arg4: memref<128x512xf32, #tpu.memory_space<vmem>>) attributes {dimension_semantics = [#tpu.dimension_semantics<parallel>], iteration_bounds = array<i64: 3>, scalar_prefetch = 0 : i64, scratch_operands = 0 : i64, tpu.core_type = #tpu.core_type<tc>, window_params = [{transform_indices = @transform_0, window_bounds = array<i64: 16, 128>}, {pipeline_mode = #tpu.pipeline_mode<synchronous>, transform_indices = @transform_1, window_bounds = array<i64: 256, 512>}, {pipeline_mode = #tpu.pipeline_mode<synchronous>, transform_indices = @transform_2, window_bounds = array<i64: 1, 512>}, {transform_indices = @transform_3, window_bounds = array<i64: 128, 512>}]} {
    %c0 = arith.constant 0 : index
    %c0_0 = arith.constant 0 : index
    %0 = vector.load %arg1[%c0, %c0_0] : memref<16x128xf32, #tpu.memory_space<vmem>>, vector<16x128xf32>
    %1 = math.cos %0 : vector<16x128xf32>
    %2 = math.sin %0 : vector<16x128xf32>
    %3 = arith.mulf %1, %1 : vector<16x128xf32>
    %4 = arith.mulf %2, %2 : vector<16x128xf32>
    %5 = arith.subf %3, %4 : vector<16x128xf32>
    %6 = arith.mulf %2, %1 : vector<16x128xf32>
    %7 = arith.mulf %1, %2 : vector<16x128xf32>
    %8 = arith.addf %6, %7 : vector<16x128xf32>
    %9 = arith.mulf %5, %1 : vector<16x128xf32>
    %10 = arith.mulf %8, %2 : vector<16x128xf32>
    %11 = arith.subf %9, %10 : vector<16x128xf32>
    %12 = arith.mulf %8, %1 : vector<16x128xf32>
    %13 = arith.mulf %5, %2 : vector<16x128xf32>
    %14 = arith.addf %12, %13 : vector<16x128xf32>
    %15 = arith.mulf %11, %1 : vector<16x128xf32>
    %16 = arith.mulf %14, %2 : vector<16x128xf32>
    %17 = arith.subf %15, %16 : vector<16x128xf32>
    %18 = arith.mulf %14, %1 : vector<16x128xf32>
    %19 = arith.mulf %11, %2 : vector<16x128xf32>
    %20 = arith.addf %18, %19 : vector<16x128xf32>
    %21 = arith.mulf %17, %1 : vector<16x128xf32>
    %22 = arith.mulf %20, %2 : vector<16x128xf32>
    %23 = arith.subf %21, %22 : vector<16x128xf32>
    %24 = arith.mulf %20, %1 : vector<16x128xf32>
    %25 = arith.mulf %17, %2 : vector<16x128xf32>
    %26 = arith.addf %24, %25 : vector<16x128xf32>
    %27 = arith.mulf %23, %1 : vector<16x128xf32>
    %28 = arith.mulf %26, %2 : vector<16x128xf32>
    %29 = arith.subf %27, %28 : vector<16x128xf32>
    %30 = arith.mulf %26, %1 : vector<16x128xf32>
    %31 = arith.mulf %23, %2 : vector<16x128xf32>
    %32 = arith.addf %30, %31 : vector<16x128xf32>
    %33 = arith.mulf %29, %1 : vector<16x128xf32>
    %34 = arith.mulf %32, %2 : vector<16x128xf32>
    %35 = arith.subf %33, %34 : vector<16x128xf32>
    %36 = arith.mulf %32, %1 : vector<16x128xf32>
    %37 = arith.mulf %29, %2 : vector<16x128xf32>
    %38 = arith.addf %36, %37 : vector<16x128xf32>
    %39 = arith.mulf %35, %1 : vector<16x128xf32>
    %40 = arith.mulf %38, %2 : vector<16x128xf32>
    %41 = arith.subf %39, %40 : vector<16x128xf32>
    %42 = arith.mulf %38, %1 : vector<16x128xf32>
    %43 = arith.mulf %35, %2 : vector<16x128xf32>
    %44 = arith.addf %42, %43 : vector<16x128xf32>
    %45 = tpu.concatenate %1, %5, %11, %17, %23, %29, %35, %41, %2, %8, %14, %20, %26, %32, %38, %44 in 0 : vector<16x128xf32>, vector<16x128xf32>, vector<16x128xf32>, vector<16x128xf32>, vector<16x128xf32>, vector<16x128xf32>, vector<16x128xf32>, vector<16x128xf32>, vector<16x128xf32>, vector<16x128xf32>, vector<16x128xf32>, vector<16x128xf32>, vector<16x128xf32>, vector<16x128xf32>, vector<16x128xf32>, vector<16x128xf32> -> vector<256x128xf32>
    %46 = tpu.transpose %45, [1, 0] : vector<256x128xf32> -> vector<128x256xf32>
    %47 = arith.truncf %46 : vector<128x256xf32> to vector<128x256xbf16>
    %c0_1 = arith.constant 0 : index
    %c0_2 = arith.constant 0 : index
    %48 = vector.load %arg2[%c0_1, %c0_2] : memref<256x512xbf16, #tpu.memory_space<vmem>>, vector<256x512xbf16>
    %cst = arith.constant dense<0.000000e+00> : vector<128x512xf32>
    %49 = tpu.matmul %47, %48, %cst {dimension_numbers = #tpu.dot_dimension_numbers<[1], [0], [0], [1], [0, 0, 1, 1], [], []>} : vector<128x256xbf16>, vector<256x512xbf16>, vector<128x512xf32> -> vector<128x512xf32>
    %c0_3 = arith.constant 0 : index
    %c0_4 = arith.constant 0 : index
    %50 = vector.load %arg3[%c0_3, %c0_4] : memref<1x512xf32, #tpu.memory_space<vmem>>, vector<1x512xf32>
    %51 = vector.broadcast %50 : vector<1x512xf32> to vector<128x512xf32>
    %52 = arith.addf %49, %51 : vector<128x512xf32>
    %c0_5 = arith.constant 0 : index
    %c0_6 = arith.constant 0 : index
    %53 = vector.load %arg4[%c0_5, %c0_6] : memref<128x512xf32, #tpu.memory_space<vmem>>, vector<128x512xf32>
    tpu.vector_store %arg4[%c0_5, %c0_6], %52 {strides = array<i32>} : memref<128x512xf32, #tpu.memory_space<vmem>>, vector<128x512xf32>,
    return
  }
  func.func @transform_0(%arg0: i32) -> (i32, i32) {
    %c0_i32 = arith.constant 0 : i32
    %c0_i32_0 = arith.constant 0 : i32
    return %c0_i32, %arg0 : i32, i32
  }
  func.func @transform_1(%arg0: i32) -> (i32, i32) {
    %c0_i32 = arith.constant 0 : i32
    %c0_i32_0 = arith.constant 0 : i32
    %c0_i32_1 = arith.constant 0 : i32
    return %c0_i32, %c0_i32_0 : i32, i32
  }
  func.func @transform_2(%arg0: i32) -> (i32, i32) {
    %c0_i32 = arith.constant 0 : i32
    %c0_i32_0 = arith.constant 0 : i32
    %c0_i32_1 = arith.constant 0 : i32
    return %c0_i32, %c0_i32_0 : i32, i32
  }
  func.func @transform_3(%arg0: i32) -> (i32, i32) {
    %c0_i32 = arith.constant 0 : i32
    %c0_i32_0 = arith.constant 0 : i32
    return %arg0, %c0_i32 : i32, i32
  }
}

</mosaic_0001>

<bundles_post_ra>
// kernel: tpu_custom_call.1
= control target key start
LH: loop header
LB: loop body
LE: loop exit
PB: predicated region body
PF: predicated region fallthrough
CT: control target
= control target key end

     0   :  { %8 = vsyncpa [#allocation3], 0  ;;  %s2666_s0 = inlined_call_operand.hbm [shape: f32[16,384], index: 0, kind: input, shape index: {}]   ;;  %s2667_s1 = inlined_call_operand.hbm [shape: bf16[256,512], index: 1, kind: input, shape index: {}]   ;;  %s2668_s2 = inlined_call_operand.vmem [shape: f32[1,512], index: 2, kind: input, shape index: {}]   ;;  %s2669_s3 = inlined_call_operand.hbm [shape: f32[384,512], index: 3, kind: output, shape index: {}]  }
   0x1   :  { %10 = vsyncpa [#allocation3 + $0x1], 0 }
   0x2   :  { %11 = vsyncpa [#allocation6], 0 }
   0x3   :  { %12 = vsyncpa [#allocation4], 0 }
   0x4   :  { %14 = vsyncpa [#allocation4 + $0x1], 0  ;;  %s2134_s12 = smov 0   ;;  %s2136_s13 = smov 0  }
   0x5   :  { %s2138_s14 = smov 0   ;;  %s2140_s15 = smov 0  }
   0x6 LB: > { %s2155_s16 = sadd.s32 4294967295, %s2096_s15   ;;  %s1576_s17 = sadd.s32 4294967294, %s2096_s15   ;;  %s2096_s15 = sphi %s2140_s15, %s2694_s15   ;;  %s2092_s14 = sphi %s2138_s14, %s2693_s14   ;;  %s2088_s13 = sphi %s2136_s13, %s2692_s13   ;;  %s2084_s12 = sphi %s2134_s12, %s2691_s12  }
   0x7   : > { %s2159_s18 = sadd.s32 1, %s2096_s15   ;;  %s27_s19 = sadd.s32 1, %s2092_s14 }
   0x8   : > { %s24_s20 = ssub.s32 %s2096_s15, %s2159_s18  ;;  %p34_p0 = scmp.ne.s32.totalorder %s2092_s14, %s2088_s13 }
   0x9   : > { %p25_p1 = scmp.eq.s32.totalorder %s24_s20, 0  ;;  %p35_p2 = scmp.eq.s32.totalorder %s2096_s15, 0 }
   0xa   : > { %p40_p3 = scmp.ne.s32.totalorder %s2088_s13, %s2084_s12  ;;  %p2670_p4 = scmp.eq.s32.totalorder %s2155_s16, 0 }
   0xb   : > { %s2171_s21 = scalar_select %p25_p1, %s2092_s14, %s27_s19  }
   0xc   : > { %p2173_p5 = por %p35_p2, %p34_p0  ;;  %p2179_p6 = por %p2670_p4, %p40_p3 }
   0xd   : > { %p106_p7 = scmp.eq.s32.totalorder %s2155_s16, 2  ;;  %p112_p8 = scmp.eq.s32.totalorder %s1576_s17, 2 }
   0xe   : > { %s2674_s22 = scalar_select %p2173_p5, 1, 0 }
   0xf   : > { %s2675_s23 = scalar_select %p2179_p6, 1, 0 }
  0x10   : > { %p1577_p9 = scmp.ge.s32.totalorder %s2096_s15, 1  ;;  %p119_p10 = scmp.lt.s32.totalorder %s2096_s15, 4 }
  0x11   : > { %p2186_p11 = por %p106_p7, %p34_p0  ;;  %p2190_p12 = por %p112_p8, %p40_p3 }
  0x12   : > { %p2194_p13 = pnand %p1577_p9, %p119_p10  ;;  %s2098_s27 = smov [#allocation5]  }
  0x13   : > { %s2676_s24 = scalar_select %p2186_p11, 1, 0 }
  0x14   : > { %s2677_s25 = scalar_select %p2190_p12, 1, 0 }
  0x15   : > { %s2678_s26 = scalar_select %p2194_p13, 1, 0 }
  0x16   : > { %p1690_p1 = pneg %p2194_p13  ;;  %s131_s28 = sshll.u32 %s2098_s27, 4  ;;  %s132_s28 = int_to_ptr.vmem [resolvable:$true] %s131_s28 }
  0x17   : > { %s148_s30 = sand.u32 1, %s2092_s14   ;;  %s1968_s6 = scalar_lea.hbm %s2667_s1, 8192 }
  0x18   : > { %p2202_p2 = pnand %p1690_p1, %p2670_p4  ;;  %p1969_p3 = scmp.ne.s32.totalorder %s2667_s1, %s1968_s6 }
  0x19   : > { %p1975_p10 = scmp.lt.u32.totalorder %s1968_s6, %s2667_s1 }
  0x1a   : > { %p1970_p7 = pneg %p2202_p2 }
  0x1c   : > { %p1971_p8 = pnand %p1970_p7, %p1969_p3 }
  0x1e   : > { %p1972_p9 = pneg %p1971_p8 }
  0x20   : > { %p1977_p1 = pnand %p1975_p10, %p1972_p9 }
  0x22   : > { %1980 = shalt.err (!%p1977_p1)
}
  0x23   : > { %s1981_s11 = scalar_lea.vmem %s132_s28, 8192  ;;  %p1989_p11 = scmp.lt.s32.totalorder %s132_s28, %s132_s28 }
  0x24   : > { %p1982_p4 = scmp.ne.s32.totalorder %s132_s28, %s1981_s11  ;;  %p1990_p6 = scmp.lt.s32.totalorder %s1981_s11, %s1981_s11 }
  0x26   : > { %p1984_p0 = pnand %p1982_p4, %p1970_p7  ;;  %p1991_p13 = por %p1990_p6, %p1989_p11 }
  0x28   : > { %p1985_p12 = pneg %p1984_p0 }
  0x2a   : > { %p1992_p5 = pnand %p1991_p13, %p1985_p12 }
  0x2c   : > { %1995 = shalt.err (!%p1992_p5)
}
  0x2d   : > { %s2099_s17 = smov 256   ;;  %s2100_s19 = smov 16  }
  0x2e   : > { %1693 = dma.hbm_to_vmem [thread:$0]  (!%p2202_p2), %s2667_s1, 8192, %s132_s28, [#allocation6], %s2099_s17, %s2099_s17, %s2100_s19  }
  0x2f   : > { %p2680_p3 = scmp.ne.s32.totalorder %s2674_s22, 0  ;;  %p2681_p8 = scmp.lt.s32.totalorder %s2096_s15, 3 }
  0x30   : > { %s1580_s5 = sshll.u32 %s148_s30, 4  ;;  %s1581_s6 = sshll.u32 %s2096_s15, 7 }
  0x31   : > { %p2228_p4 = pnand %p2681_p8, %p2680_p3  ;;  %s2236_s9 = scalar_lea.hbm %s2666_s0, %s1581_s6 }
  0x32   : > { %s152_s28 = scalar_lea.vmem [#allocation2], %s1580_s5  ;;  %s2240_s29 = scalar_lea.sflag [#allocation3], %s148_s30 }
  0x33   : > { %s158_s22 = sshll.u32 %s152_s28, 4  ;;  %s1996_s10 = scalar_lea.hbm %s2236_s9, 256  ;;  %s2238_s22 = int_to_ptr.vmem [resolvable:$true] %s158_s22 }
  0x34   : > { %p1997_p5 = scmp.ne.s32.totalorder %s2236_s9, %s1996_s10  ;;  %p1998_p6 = pneg %p2228_p4 }
  0x35   : > { %s2001_s19 = scalar_lea.hbm %s2666_s0, 768  ;;  %p2002_p13 = scmp.lt.u32.totalorder %s2236_s9, %s2666_s0 }
  0x36   : > { %p1999_p11 = pnand %p1998_p6, %p1997_p5  ;;  %p2003_p2 = scmp.lt.u32.totalorder %s2001_s19, %s1996_s10 }
  0x37   : > { %p2005_p7 = scmp.lt.u32.totalorder %s1996_s10, %s2236_s9 }
  0x38   : > { %p2000_p12 = pneg %p1999_p11  ;;  %p2004_p0 = por %p2003_p2, %p2002_p13 }
  0x3a   : > { %p2006_p9 = por %p2005_p7, %p2004_p0 }
  0x3c   : > { %p2007_p10 = pnand %p2006_p9, %p2000_p12 }
  0x3e   : > { %2010 = shalt.err (!%p2007_p10)
}
  0x3f   : > { %s2011_s30 = scalar_lea.vmem %s2238_s22, 256  ;;  %s2101_s5 = smov [#allocation2]  }
  0x40   : > { %p2012_p1 = scmp.ne.s32.totalorder %s2238_s22, %s2011_s30  ;;  %s2016_s6 = sshll.u32 %s2101_s5, 4  ;;  %s2017_s6 = int_to_ptr.vmem [resolvable:$false] %s2016_s6 }
  0x41   : > { %s2018_s7 = scalar_lea.vmem %s2017_s6, 512  ;;  %p2019_p5 = scmp.lt.s32.totalorder %s2238_s22, %s2017_s6 }
  0x42   : > { %p2014_p3 = pnand %p2012_p1, %p1998_p6  ;;  %p2020_p11 = scmp.lt.s32.totalorder %s2018_s7, %s2011_s30 }
  0x44   : > { %p2015_p8 = pneg %p2014_p3  ;;  %p2021_p13 = por %p2020_p11, %p2019_p5 }
  0x46   : > { %p2022_p2 = pnand %p2021_p13, %p2015_p8 }
  0x48   : > { %2025 = shalt.err (!%p2022_p2)
}
  0x49   : > { %s2102_s8 = smov 384   ;;  %s2103_s28 = smov 128  }
  0x4a   : > { %s2104_s10 = smov 8   ;;  %p2683_p6 = scmp.ne.s32.totalorder %s2678_s26, 0 }
  0x4b   : > { %1697 = dma.hbm_to_vmem [thread:$0]  (!%p2228_p4), %s2236_s9, 256, %s2238_s22, %s2240_s29, %s2102_s8, %s2103_s28, %s2104_s10  }
  0x4c   : > { %170 = sbr.rel (%p2683_p6) target bundleno = 601 (0x259), region = 32  ;;  %s2271_s11 = sand.u32 (!%p2683_p6), 1, %s2088_s13  }
  0x4d   : > { %s1583_s17 = sshll.u32 (!%p2683_p6), %s2271_s11, 4  ;;  %s173_s19 = scalar_lea.sflag (!%p2683_p6), [#allocation3], %s2271_s11 }
  0x4e   : > { %s176_s20 = scalar_lea.vmem (!%p2683_p6), [#allocation2], %s1583_s17  ;;  %p2684_p12 = scmp.ne.s32.totalorder (!%p2683_p6), %s2675_s23, 0 }
  0x53   : > { %2071 = dma.done.wait (%p2684_p12), %s173_s19, 256  }
  0x54   : > { %2073 = vsyncadd (%p2684_p12), %s173_s19, 4294967040  ;;  %p2685_p0 = scmp.eq.s32.totalorder %s2155_s16, 0 }
  0x56   : > { %2075 = dma.done.wait (%p2685_p0), [#allocation6], 8192   ;;  %p2686_p4 = pmov %p2685_p0 }
  0x57   : > { %v2283_v0 = vld [vmem:[%s176_s20] sm:$0xff]  ;;  %v2285_v1 = vld [vmem:[%s176_s20 + $0x8] sm:$0xff]  ;;  %v2105_v24 = vmov 683565275   ;;  %v2106_v26 = vmov 2475754826  }
  0x58   : > { %2077 = vsyncadd (%p2686_p4), [#allocation6], 4294959104  ;;  %v206_v2 = vand.u32 2147483647, %v2283_v0  ;;  %v209_v3 = vand.u32 2139095040, %v2283_v0  ;;  %v312_v5 = vand.u32 2139095040, %v2285_v1 }
  0x59   : > { %v309_v4 = vand.u32 2147483647, %v2285_v1  ;;  %v2107_v28 = vmov 2131351028   ;;  %v2108_v30 = vmov 2102212464  }
  0x5a   : > { %v210_v6 = vshrl.u32 %v209_v3, 23  ;;  %v213_v7 = vand.u32 8388607, %v206_v2  ;;  %v313_v8 = vshrl.u32 %v312_v5, 23  ;;  %v2109_v32 = vmov 920167782  }
  0x5b   : > { %v316_v9 = vand.u32 8388607, %v309_v4  ;;  %v2110_v40 = vmov 1326507024   ;;  %v1864_v5 = vld [vmem:[#allocation5 + $0x4] ss:$16 sps:$4 sm:$0xff]  }
  0x5c   : > { %v1586_v10 = vadd.s32 4294967169, %v210_v6  ;;  %v1590_v11 = vadd.s32 4294967169, %v313_v8  ;;  %v214_v13 = vor.u32 8388608, %v213_v7  ;;  %v1866_v6 = vld [vmem:[#allocation5 + $0xc] ss:$16 sps:$4 sm:$0xff]   ;;  %1188 = vmatprep.subr.bf16.mxu0 %v1864_v5  ;;  %vm208_vm15 = vcmp.lt.s32.totalorder %v2283_v0, 0 }
  0x5d   : > { %v317_v14 = vor.u32 8388608, %v316_v9  ;;  %v1868_v7 = vld [vmem:[#allocation5] ss:$16 sps:$4 sm:$0xff]   ;;  %1301 = vmatprep.subr.bf16.mxu1 %v1866_v6  ;;  %vm2383_vm14 = vcmp.le.f32.partialorder %v206_v2, 0.7853982  ;;  %s1585_s4 = sshll.u32 %s2271_s11, 9 }
  0x5e   : > { %v216_v12 = vadd.s32 1, %v1586_v10  ;;  %v319_v15 = vadd.s32 1, %v1590_v11  ;;  %v2295_v20 = vshll.u32 %v214_v13, 8  ;;  %v1870_v13 = vld [vmem:[#allocation5 + $0x24] ss:$16 sps:$4 sm:$0xff]   ;;  %1189 = vmatpush1.bf16.msra.mxu0 %v1868_v7  ;;  %s2490_s9 = scalar_lea.vmem [#allocation7], %s1585_s4 }
  0x5f   : > { %v2299_v22 = vshll.u32 %v317_v14, 8  ;;  %v1872_v14 = vld [vmem:[#allocation5 + $0x2c] ss:$16 sps:$4 sm:$0xff]   ;;  %1190 = vmatprep.subr.bf16.mxu0 %v1870_v13  ;;  %v1892_v6 = vld [vmem:[#allocation5 + $0x80] ss:$16 sps:$4 sm:$0xff]   ;;  %s1673_s22 = sshll.u32 %s2155_s16, 13 }
  0x60   : > { %vm217_vm0 = vcmp.gt.s32.totalorder %v216_v12, 0  ;;  %vm320_vm1 = vcmp.gt.s32.totalorder %v319_v15, 0  ;;  %v1893_v7 = vld [vmem:[#allocation5 + $0x88] ss:$16 sps:$4 sm:$0xff]   ;;  %v1932_v2 = vld [vmem:[#allocation5 + $0x16c] ss:$16 sps:$4 sm:$0xff]   ;;  %s2613_s30 = scalar_lea.hbm %s2669_s3, %s1673_s22 }
  0x61   : > { %v218_v16 = vsel %vm217_vm0, %v216_v12, 0  ;;  %v321_v19 = vsel %vm320_vm1, %v319_v15, 0  ;;  %v1869_v12 = vld [vmem:[#allocation5 + $0x8] ss:$16 sps:$4 sm:$0xff]   ;;  %vm311_vm0 = vcmp.lt.s32.totalorder %v2285_v1, 0  ;;  %s1493_s29 = sshll.u32 %s2490_s9, 4  ;;  %s2615_s29 = int_to_ptr.vmem [resolvable:$true] %s1493_s29 }
  0x62   : > { %v219_v17 = vshrl.u32 %v218_v16, 5  ;;  %v220_v18 = vand.u32 31, %v218_v16  ;;  %v2297_v21 = vand.u32 31, %v321_v19  ;;  %v2301_v34 = vshrl.u32 %v321_v19, 5  ;;  %1302 = vmatpush1.bf16.msra.mxu1 %v1869_v12  ;;  %s1479_s5 = scalar_lea.sflag [#allocation4], %s2271_s11  ;;  %s2026_s6 = scalar_lea.vmem %s2615_s29, 8192 }
  0x63   : > { %1303 = vmatprep.subr.bf16.mxu1 %v1872_v14  ;;  %vm310_vm1 = vcmp.le.f32.partialorder %v309_v4, 0.7853982  ;;  %v1946_v4 = vld [vmem:[#allocation5 + $0x1a0] ss:$16 sps:$4 sm:$0xff]   ;;  %p2027_p7 = scmp.ne.s32.totalorder %s2615_s29, %s2026_s6  ;;  %p2689_p9 = scmp.ne.s32.totalorder %s2676_s24, 0 }
  0x64   : > { %v221_v23 = vsub.s32 32, %v220_v18  ;;  %v223_v25 = vshll.u32 %v2105_v24, %v220_v18  ;;  %v226_v27 = vshll.u32 %v2106_v26, %v220_v18  ;;  %v229_v29 = vshll.u32 %v2107_v28, %v220_v18  ;;  %s2111_s7 = smov [#allocation7]  }
  0x65   : > { %v232_v31 = vshll.u32 %v2108_v30, %v220_v18  ;;  %v235_v33 = vshll.u32 %v2109_v32, %v220_v18  ;;  %vm238_vm2 = vcmp.lt.s32.totalorder %v219_v17, 1  ;;  %vm239_vm3 = vcmp.lt.s32.totalorder %v219_v17, 2  ;;  %p2028_p10 = pnand %p2027_p7, %p2689_p9  ;;  %s2030_s8 = sshll.u32 %s2111_s7, 4  ;;  %s2031_s8 = int_to_ptr.vmem [resolvable:$false] %s2030_s8 }
  0x66   : > { %v222_v35 = vshrl.u32 %v2105_v24, %v221_v23  ;;  %v224_v36 = vshrl.u32 %v2106_v26, %v221_v23  ;;  %v227_v37 = vshrl.u32 %v2107_v28, %v221_v23  ;;  %v230_v38 = vshrl.u32 %v2108_v30, %v221_v23  ;;  %s2032_s28 = scalar_lea.vmem %s2031_s8, 16384  ;;  %p2033_p3 = scmp.lt.s32.totalorder %s2615_s29, %s2031_s8 }
  0x67   : > { %v233_v39 = vshrl.u32 %v2109_v32, %v221_v23  ;;  %v236_v41 = vshrl.u32 %v2110_v40, %v221_v23  ;;  %vm241_vm4 = vcmp.lt.s32.totalorder %v219_v17, 4  ;;  %v324_v45 = vsub.s32 32, %v2297_v21  ;;  %p2029_p1 = pneg %p2028_p10  ;;  %p2034_p8 = scmp.lt.s32.totalorder %s2032_s28, %s2026_s6 }
  0x68   : > { %v225_v42 = vor.u32 %v224_v36, %v223_v25  ;;  %v228_v43 = vor.u32 %v227_v37, %v226_v27  ;;  %v231_v44 = vor.u32 %v230_v38, %v229_v29  ;;  %vm240_vm5 = vcmp.lt.s32.totalorder %v219_v17, 3  ;;  %v1875_v27 = vld [vmem:[#allocation5 + $0x28] ss:$16 sps:$4 sm:$0xff]  }
  0x69   : > { %v234_v46 = vor.u32 %v233_v39, %v232_v31  ;;  %v237_v47 = vor.u32 %v236_v41, %v235_v33  ;;  %v326_v48 = vshll.u32 %v2105_v24, %v2297_v21  ;;  %v329_v56 = vshll.u32 %v2106_v26, %v2297_v21  ;;  %1304 = vmatpush1.bf16.msra.mxu1 %v1875_v27  ;;  %v1905_v27 = vld [vmem:[#allocation5 + $0xc8] ss:$16 sps:$4 sm:$0xff]   ;;  %p2035_p5 = por %p2034_p8, %p2033_p3 }
  0x6a   : > { %v242_v49 = vsel %vm238_vm2, %v222_v35, %v225_v42  ;;  %v243_v50 = vsel %vm241_vm4, %v231_v44, 2102212464  ;;  %v246_v51 = vsel %vm238_vm2, %v225_v42, %v228_v43  ;;  %v250_v52 = vsel %vm238_vm2, %v228_v43, %v231_v44 }
  0x6b   : > { %v244_v53 = vsel %vm240_vm5, %v228_v43, %v243_v50  ;;  %v247_v54 = vsel %vm241_vm4, %v234_v46, 920167782  ;;  %v251_v55 = vsel %vm241_vm4, %v237_v47, 1326507024  ;;  %v325_v59 = vshrl.u32 %v2105_v24, %v324_v45  ;;  %v1884_v50 = vld [vmem:[#allocation5 + $0x6c] ss:$16 sps:$4 sm:$0xff]   ;;  %p2036_p11 = pnand %p2035_p5, %p2029_p1 }
  0x6c   : > { %v248_v57 = vsel %vm240_vm5, %v231_v44, %v247_v54  ;;  %v252_v58 = vsel %vm240_vm5, %v234_v46, %v251_v55  ;;  %v327_v60 = vshrl.u32 %v2106_v26, %v324_v45  ;;  %v245_v61 = vsel %vm239_vm3, %v242_v49, %v244_v53  ;;  %v1874_v26 = vld [vmem:[#allocation5 + $0x20] ss:$16 sps:$4 sm:$0xff]   ;;  %v1882_v49 = vld [vmem:[#allocation5 + $0x64] ss:$16 sps:$4 sm:$0xff]  }
  0x6d   : > { %v249_v62 = vsel %vm239_vm3, %v246_v51, %v248_v57  ;;  %v253_v63 = vsel %vm239_vm3, %v250_v52, %v252_v58  ;;  %v330_v3 = vshrl.u32 %v2107_v28, %v324_v45  ;;  %v332_v17 = vshll.u32 %v2107_v28, %v2297_v21  ;;  %v1876_v28 = vld [vmem:[#allocation5 + $0x44] ss:$16 sps:$4 sm:$0xff]   ;;  %1191 = vmatpush1.bf16.msra.mxu0 %v1874_v26  ;;  %v1880_v44 = vld [vmem:[#allocation5 + $0x40] ss:$16 sps:$4 sm:$0xff]  }
  0x6e   : > { %v2313_v8 = vmul.u32.u64.low %v2295_v20, %v253_v63  ;;  %v2314_v9 = vmul.u32.u64.high %v2295_v20, %v253_v63, %v2313_v8  ;;  %v2317_v10 = vmul.u32.u64.low %v2295_v20, %v249_v62  ;;  %v2318_v11 = vmul.u32.u64.high %v2295_v20, %v249_v62, %v2317_v10  ;;  %1192 = vmatprep.subr.bf16.mxu0 %v1876_v28  ;;  %v1886_v58 = vld [vmem:[#allocation5 + $0x60] ss:$16 sps:$4 sm:$0xff]   ;;  %v1908_v28 = vld [vmem:[#allocation5 + $0xec] ss:$16 sps:$4 sm:$0xff]  }
  0x6f   : > { %v328_v15 = vor.u32 %v327_v60, %v326_v48  ;;  %v331_v16 = vor.u32 %v330_v3, %v329_v56  ;;  %v333_v18 = vshrl.u32 %v2108_v30, %v324_v45  ;;  %v335_v19 = vshll.u32 %v2108_v30, %v2297_v21  ;;  %v1904_v26 = vld [vmem:[#allocation5 + $0xc0] ss:$16 sps:$4 sm:$0xff]  }
  0x70   : > { %v336_v23 = vshrl.u32 %v2109_v32, %v324_v45  ;;  %v338_v24 = vshll.u32 %v2109_v32, %v2297_v21  ;;  %v339_v25 = vshrl.u32 %v2110_v40, %v324_v45  ;;  %v261_v29 = vmul.u32 %v2295_v20, %v245_v61  ;;  %v1878_v32 = vld [vmem:[#allocation5 + $0x4c] ss:$16 sps:$4 sm:$0xff]   ;;  %v1881_v45 = vld [vmem:[#allocation5 + $0x48] ss:$16 sps:$4 sm:$0xff]  }
  0x71   : > { %v334_v31 = vor.u32 %v333_v18, %v332_v17  ;;  %vm341_vm6 = vcmp.lt.s32.totalorder %v2301_v34, 1  ;;  %vm342_vm7 = vcmp.lt.s32.totalorder %v2301_v34, 2  ;;  %vm263_vm8 = vc.u32 %v2314_v9, %v2317_v10  ;;  %1305 = vmatprep.subr.bf16.mxu1 %v1878_v32  ;;  %1193 = vmatpush1.bf16.msra.mxu0 %v1880_v44  ;;  %v1890_v61 = vld [vmem:[#allocation5 + $0x8c] ss:$16 sps:$4 sm:$0xff]   ;;  %v1900_v18 = vld [vmem:[#allocation5 + $0xc4] ss:$16 sps:$4 sm:$0xff]  }
  0x72   : > { %v264_v30 = vadd.s32 1, %v2318_v11  ;;  %v337_v21 = vor.u32 %v336_v23, %v335_v19  ;;  %vm343_vm9 = vcmp.lt.s32.totalorder %v2301_v34, 3  ;;  %v340_v20 = vor.u32 %v339_v25, %v338_v24  ;;  %1306 = vmatpush1.bf16.msra.mxu1 %v1881_v45  ;;  %1194 = vmatprep.subr.bf16.mxu0 %v1882_v49  ;;  %v1902_v19 = vld [vmem:[#allocation5 + $0xcc] ss:$16 sps:$4 sm:$0xff]   ;;  %v1916_v44 = vld [vmem:[#allocation5 + $0x100] ss:$16 sps:$4 sm:$0xff]  }
  0x73   : > { %vm344_vm10 = vcmp.lt.s32.totalorder %v2301_v34, 4  ;;  %v345_v33 = vsel %vm341_vm6, %v325_v59, %v328_v15  ;;  %v349_v35 = vsel %vm341_vm6, %v328_v15, %v331_v16  ;;  %v353_v39 = vsel %vm341_vm6, %v331_v16, %v334_v31  ;;  %v1887_v59 = vld [vmem:[#allocation5 + $0x68] ss:$16 sps:$4 sm:$0xff]   ;;  %1307 = vmatprep.subr.bf16.mxu1 %v1884_v50  ;;  %v1888_v34 = vld [vmem:[#allocation5 + $0x84] ss:$16 sps:$4 sm:$0xff]  }
  0x74   : > { %v265_v36 = vsel %vm263_vm8, %v264_v30, %v2318_v11  ;;  %v346_v37 = vsel %vm344_vm10, %v334_v31, 2102212464  ;;  %v350_v38 = vsel %vm344_vm10, %v337_v21, 920167782  ;;  %v354_v43 = vsel %vm344_vm10, %v340_v20, 1326507024 }
  0x75   : > { %v266_v40 = vadd.s32 %v265_v36, %v261_v29  ;;  %v347_v41 = vsel %vm343_vm9, %v331_v16, %v346_v37  ;;  %v351_v42 = vsel %vm343_vm9, %v334_v31, %v350_v38  ;;  %v355_v48 = vsel %vm343_vm9, %v337_v21, %v354_v43  ;;  %1195 = vmatpush1.bf16.msra.mxu0 %v1886_v58  ;;  %v1896_v11 = vld [vmem:[#allocation5 + $0xac] ss:$16 sps:$4 sm:$0xff]   ;;  %v1898_v15 = vld [vmem:[#allocation5 + $0xa0] ss:$16 sps:$4 sm:$0xff]   ;;  %v1899_v16 = vld [vmem:[#allocation5 + $0xa8] ss:$16 sps:$4 sm:$0xff]  }
  0x76   : > { %v348_v46 = vsel %vm342_vm7, %v345_v33, %v347_v41  ;;  %v352_v47 = vsel %vm342_vm7, %v349_v35, %v351_v42  ;;  %v356_v52 = vsel %vm342_vm7, %v353_v39, %v355_v48  ;;  %1308 = vmatpush1.bf16.msra.mxu1 %v1887_v59  ;;  %1196 = vmatprep.subr.bf16.mxu0 %v1888_v34  ;;  %v1906_v31 = vld [vmem:[#allocation5 + $0xe4] ss:$16 sps:$4 sm:$0xff]   ;;  %v1910_v36 = vld [vmem:[#allocation5 + $0xe0] ss:$16 sps:$4 sm:$0xff]   ;;  %v1911_v37 = vld [vmem:[#allocation5 + $0xe8] ss:$16 sps:$4 sm:$0xff]   ;;  %vm298_vm8 = vweird.f32 %v2283_v0 }
  0x77   : > { %v267_v51 = vadd.s32 536870912, %v266_v40  ;;  %v2352_v53 = vmul.u32.u64.low %v2299_v22, %v352_v47  ;;  %v2353_v54 = vmul.u32.u64.high %v2299_v22, %v352_v47, %v2352_v53  ;;  %v364_v60 = vmul.u32 %v2299_v22, %v348_v46  ;;  %1309 = vmatprep.subr.bf16.mxu1 %v1890_v61  ;;  %v1912_v39 = vld [vmem:[#allocation5 + $0x104] ss:$16 sps:$4 sm:$0xff]   ;;  %v1917_v45 = vld [vmem:[#allocation5 + $0x108] ss:$16 sps:$4 sm:$0xff]  }
  0x78   : > { %v2357_v55 = vmul.u32.u64.low %v2299_v22, %v356_v52  ;;  %v2358_v56 = vmul.u32.u64.high %v2299_v22, %v356_v52, %v2357_v55  ;;  %v1894_v22 = vld [vmem:[#allocation5 + $0xa4] ss:$16 sps:$4 sm:$0xff]   ;;  %v262_v30 = vadd.s32 %v2317_v10, %v2314_v9  ;;  %v1920_v48 = vld [vmem:[#allocation5 + $0x12c] ss:$16 sps:$4 sm:$0xff]   ;;  %v1922_v52 = vld [vmem:[#allocation5 + $0x120] ss:$16 sps:$4 sm:$0xff]  }
  0x79   : > { %v2360_v57 = vshrl.u32 %v267_v51, 30  ;;  %v367_v63 = vadd.s32 1, %v2353_v54  ;;  %1197 = vmatpush1.bf16.msra.mxu0 %v1892_v6  ;;  %v1918_v47 = vld [vmem:[#allocation5 + $0x124] ss:$16 sps:$4 sm:$0xff]   ;;  %v1923_v59 = vld [vmem:[#allocation5 + $0x128] ss:$16 sps:$4 sm:$0xff]  }
  0x7a   : > { %vm366_vm11 = vc.u32 %v2358_v56, %v2352_v53  ;;  %1310 = vmatpush1.bf16.msra.mxu1 %v1893_v7  ;;  %1198 = vmatprep.subr.bf16.mxu0 %v1894_v22  ;;  %v365_v51 = vadd.s32 %v2352_v53, %v2358_v56  ;;  %v1929_v22 = vld [vmem:[#allocation5 + $0x148] ss:$16 sps:$4 sm:$0xff]  }
  0x7b   : > { %v269_v62 = vshll.u32 %v2360_v57, 30  ;;  %v368_v5 = vsel %vm366_vm11, %v367_v63, %v2353_v54  ;;  %1311 = vmatprep.subr.bf16.mxu1 %v1896_v11  ;;  %v292_v55 = vsub.s32 4, %v2360_v57  ;;  %v1926_v63 = vld [vmem:[#allocation5 + $0x14c] ss:$16 sps:$4 sm:$0xff]  }
  0x7c   : > { %v369_v8 = vadd.s32 %v368_v5, %v364_v60 }
  0x7d   : > { %v270_v3 = vsub.s32 %v266_v40, %v269_v62  ;;  %1199 = vmatpush1.bf16.msra.mxu0 %v1898_v15  ;;  %v1914_v40 = vld [vmem:[#allocation5 + $0x10c] ss:$16 sps:$4 sm:$0xff]   ;;  %v1924_v62 = vld [vmem:[#allocation5 + $0x144] ss:$16 sps:$4 sm:$0xff]   ;;  %v293_v7 = vsel %vm208_vm15, %v292_v55, %v2360_v57 }
  0x7e   : > { %v370_v13 = vadd.s32 536870912, %v369_v8  ;;  %1312 = vmatpush1.bf16.msra.mxu1 %v1899_v16  ;;  %1200 = vmatprep.subr.bf16.mxu0 %v1900_v18  ;;  %v295_v16 = vsel %vm2383_vm14, 0, %v293_v7 }
  0x7f   : > { %v272_v12 = vsub.s32 0, %v270_v3  ;;  %1313 = vmatprep.subr.bf16.mxu1 %v1902_v19  ;;  %v1934_v19 = vld [vmem:[#allocation5 + $0x160] ss:$16 sps:$4 sm:$0xff]  }
  0x80   : > { %v2368_v17 = vshrl.u32 %v370_v13, 30  ;;  %v1930_v13 = vld [vmem:[#allocation5 + $0x164] ss:$16 sps:$4 sm:$0xff]  }
  0x81   : > { %v1587_v14 = vmin.u32 %v272_v12, %v270_v3  ;;  %1201 = vmatpush1.bf16.msra.mxu0 %v1904_v26 }
  0x82   : > { %v372_v24 = vshll.u32 %v2368_v17, 30  ;;  %1314 = vmatpush1.bf16.msra.mxu1 %v1905_v27  ;;  %1202 = vmatprep.subr.bf16.mxu0 %v1906_v31  ;;  %v395_v26 = vsub.s32 4, %v2368_v17  ;;  %v1938_v27 = vld [vmem:[#allocation5 + $0x18c] ss:$16 sps:$4 sm:$0xff]  }
  0x83   : > { %v274_v23 = vclz %v1587_v14  ;;  %1315 = vmatprep.subr.bf16.mxu1 %v1908_v28  ;;  %v1940_v28 = vld [vmem:[#allocation5 + $0x180] ss:$16 sps:$4 sm:$0xff]  }
  0x84   : > { %v2371_v29 = vsub.s32 %v369_v8, %v372_v24  ;;  %v1928_v8 = vld [vmem:[#allocation5 + $0x140] ss:$16 sps:$4 sm:$0xff]   ;;  %v1936_v24 = vld [vmem:[#allocation5 + $0x184] ss:$16 sps:$4 sm:$0xff]  }
  0x85   : > { %v1588_v25 = vadd.s32 4294967294, %v274_v23  ;;  %1203 = vmatpush1.bf16.msra.mxu0 %v1910_v36  ;;  %v1935_v23 = vld [vmem:[#allocation5 + $0x168] ss:$16 sps:$4 sm:$0xff]  }
  0x86   : > { %v375_v32 = vsub.s32 0, %v2371_v29  ;;  %1316 = vmatpush1.bf16.msra.mxu1 %v1911_v37  ;;  %1204 = vmatprep.subr.bf16.mxu0 %v1912_v39 }
  0x87   : > { %vm1589_vm12 = vcmp.lt.s32.totalorder %v1588_v25, 0  ;;  %1317 = vmatprep.subr.bf16.mxu1 %v1914_v40  ;;  %v1947_v40 = vld [vmem:[#allocation5 + $0x1a8] ss:$16 sps:$4 sm:$0xff]  }
  0x88   : > { %v277_v21 = vsel %vm1589_vm12, 0, %v1588_v25  ;;  %v1591_v38 = vmin.u32 %v375_v32, %v2371_v29  ;;  %v396_v32 = vsel %vm311_vm0, %v395_v26, %v2368_v17 }
  0x89   : > { %v278_v20 = vsub.s32 32, %v277_v21  ;;  %v279_v33 = vshll.u32 %v270_v3, %v277_v21  ;;  %v282_v35 = vsub.s32 4294967266, %v277_v21  ;;  %1205 = vmatpush1.bf16.msra.mxu0 %v1916_v44  ;;  %v398_v39 = vsel %vm310_vm1, 0, %v396_v32 }
  0x8a   : > { %v377_v9 = vclz %v1591_v38  ;;  %1318 = vmatpush1.bf16.msra.mxu1 %v1917_v45  ;;  %1206 = vmatprep.subr.bf16.mxu0 %v1918_v47 }
  0x8b   : > { %v280_v41 = vshrl.u32 %v262_v30, %v278_v20  ;;  %v283_v42 = vadd.s32 127, %v282_v35  ;;  %1319 = vmatprep.subr.bf16.mxu1 %v1920_v48  ;;  %v1941_v30 = vld [vmem:[#allocation5 + $0x188] ss:$16 sps:$4 sm:$0xff]   ;;  %v1942_v20 = vld [vmem:[#allocation5 + $0x1a4] ss:$16 sps:$4 sm:$0xff]   ;;  %v299_v35 = vand.u32 3, %v295_v16 }
  0x8c   : > { %v1592_v46 = vadd.s32 4294967294, %v377_v9  ;;  %v609_v9 = vadd.s32 3, %v398_v39 }
  0x8d   : > { %v281_v10 = vor.u32 %v280_v41, %v279_v33  ;;  %v284_v43 = vshll.u32 %v283_v42, 23  ;;  %1207 = vmatpush1.bf16.msra.mxu0 %v1922_v52  ;;  %v1944_v33 = vld [vmem:[#allocation5 + $0x1ac] ss:$16 sps:$4 sm:$0xff]   ;;  %vm304_vm2 = vcmp.eq.s32.totalorder %v299_v35, 2  ;;  %vm301_vm4 = vcmp.eq.s32.totalorder %v299_v35, 0 }
  0x8e   : > { %vm1593_vm13 = vcmp.lt.s32.totalorder %v1592_v46, 0  ;;  %1320 = vmatpush1.bf16.msra.mxu1 %v1923_v59  ;;  %1208 = vmatprep.subr.bf16.mxu0 %v1924_v62  ;;  %vm300_vm6 = vcmp.lt.s32.totalorder %v299_v35, 2 }
  0x8f   : > { %v285_v49 = vor.u32 4788187, %v284_v43  ;;  %v288_v50 = vcvt.s32.f32 %v281_v10  ;;  %v380_v58 = vsel %vm1593_vm13, 0, %v1592_v46  ;;  %1321 = vmatprep.subr.bf16.mxu1 %v1926_v63 }
  0x90   : > { %v381_v60 = vsub.s32 32, %v380_v58  ;;  %v382_v34 = vshll.u32 %v2371_v29, %v380_v58  ;;  %v385_v61 = vsub.s32 4294967266, %v380_v58  ;;  %v505_v29 = vadd.s32 3, %v295_v16 }
  0x91   : > { %v286_v54 = vand.u32 2147483647, %v285_v49  ;;  %1209 = vmatpush1.bf16.msra.mxu0 %v1928_v8  ;;  %v402_v49 = vand.u32 3, %v398_v39  ;;  %v1948_v8 = vld [vmem:[#allocation5 + $0x1c4] ss:$16 sps:$4 sm:$0xff]  }
  0x92   : > { %v383_v56 = vshrl.u32 %v365_v51, %v381_v60  ;;  %v386_v5 = vadd.s32 127, %v385_v61  ;;  %1322 = vmatpush1.bf16.msra.mxu1 %v1929_v22  ;;  %1210 = vmatprep.subr.bf16.mxu0 %v1930_v13  ;;  %v506_v36 = vand.u32 3, %v505_v29  ;;  %v1950_v22 = vld [vmem:[#allocation5 + $0x1cc] ss:$16 sps:$4 sm:$0xff]  }
  0x93   : > { %v289_v3 = vmul.f32 %v288_v50, %v286_v54  ;;  %1323 = vmatprep.subr.bf16.mxu1 %v1932_v2  ;;  %v610_v50 = vand.u32 3, %v609_v9  ;;  %vm407_vm9 = vcmp.eq.s32.totalorder %v402_v49, 2  ;;  %vm404_vm11 = vcmp.eq.s32.totalorder %v402_v49, 0  ;;  %v1952_v2 = vld [vmem:[#allocation5 + $0x1c0] ss:$16 sps:$4 sm:$0xff]  }
  0x94   : > { %v384_v11 = vor.u32 %v383_v56, %v382_v34  ;;  %v387_v12 = vshll.u32 %v386_v5, 23  ;;  %vm511_vm3 = vcmp.eq.s32.totalorder %v506_v36, 2  ;;  %vm508_vm5 = vcmp.eq.s32.totalorder %v506_v36, 0  ;;  %v1956_v29 = vld [vmem:[#allocation5 + $0x1ec] ss:$16 sps:$4 sm:$0xff]  }
  0x95   : > { %v290_v6 = vxor.u32 2147483648, %v289_v3  ;;  %1211 = vmatpush1.bf16.msra.mxu0 %v1934_v19  ;;  %vm507_vm7 = vcmp.lt.s32.totalorder %v506_v36, 2  ;;  %vm615_vm10 = vcmp.eq.s32.totalorder %v610_v50, 2  ;;  %vm612_vm12 = vcmp.eq.s32.totalorder %v610_v50, 0 }
  0x96   : > { %v388_v18 = vor.u32 4788187, %v387_v12  ;;  %v391_v57 = vcvt.s32.f32 %v384_v11  ;;  %1324 = vmatpush1.bf16.msra.mxu1 %v1935_v23  ;;  %1212 = vmatprep.subr.bf16.mxu0 %v1936_v24  ;;  %vm403_vm13 = vcmp.lt.s32.totalorder %v402_v49, 2 }
  0x97   : > { %v291_v14 = vsel %vm208_vm15, %v290_v6, %v289_v3  ;;  %1325 = vmatprep.subr.bf16.mxu1 %v1938_v27  ;;  %vm401_vm15 = vweird.f32 %v2285_v1  ;;  %v1954_v27 = vld [vmem:[#allocation5 + $0x1e4] ss:$16 sps:$4 sm:$0xff]  }
  0x98   : > { %v294_v15 = vsel %vm2383_vm14, %v2283_v0, %v291_v14  ;;  %v389_v25 = vand.u32 2147483647, %v388_v18  ;;  %vm611_vm14 = vcmp.lt.s32.totalorder %v610_v50, 2  ;;  %v1953_v14 = vld [vmem:[#allocation5 + $0x1c8] ss:$16 sps:$4 sm:$0xff]  }
  0x99   : > { %1960 = vcosq.f32 %v294_v15  ;;  %1213 = vmatpush1.bf16.msra.mxu0 %v1940_v28  ;;  %v1959_v28 = vld [vmem:[#allocation5 + $0x1e8] ss:$16 sps:$4 sm:$0xff]  }
  0x9a   : > { %1962 = vsinq.f32 %v294_v15  ;;  %v392_v31 = vmul.f32 %v391_v57, %v389_v25  ;;  %1326 = vmatpush1.bf16.msra.mxu1 %v1941_v30  ;;  %1214 = vmatprep.subr.bf16.mxu0 %v1942_v20 }
  0x9b   : > { %1327 = vmatprep.subr.bf16.mxu1 %v1944_v33 }
  0x9c   : > { %v393_v21 = vxor.u32 2147483648, %v392_v31 }
  0x9d   : > { %1215 = vmatpush1.bf16.msra.mxu0 %v1946_v4 }
  0x9e   : > { %v394_v37 = vsel %vm311_vm0, %v393_v21, %v392_v31  ;;  %1328 = vmatpush1.bf16.msra.mxu1 %v1947_v40  ;;  %1216 = vmatprep.subr.bf16.mxu0 %v1948_v8  ;;  %v1958_v31 = vld [vmem:[#allocation5 + $0x1e0] ss:$16 sps:$4 sm:$0xff]  }
  0x9f   : > { %v397_v38 = vsel %vm310_vm1, %v2285_v1, %v394_v37  ;;  %1329 = vmatprep.subr.bf16.mxu1 %v1950_v22 }
  0xa0   : > { %1964 = vcosq.f32 %v397_v38 }
  0xa1   : > { %1966 = vsinq.f32 %v397_v38  ;;  %1217 = vmatpush1.bf16.msra.mxu0 %v1952_v2 }
  0xa2   : > { %1330 = vmatpush1.bf16.msra.mxu1 %v1953_v14  ;;  %1218 = vmatprep.subr.bf16.mxu0 %v1954_v27 }
  0xa3   : > { %v1961_v41 = vpop.eup %1960  ;;  %1331 = vmatprep.subr.bf16.mxu1 %v1956_v29 }
  0xa4   : > { %v1963_v17 = vpop.eup %1962  ;;  %v305_v42 = vxor.u32 2147483648, %v1961_v41 }
  0xa5   : > { %v302_v10 = vxor.u32 2147483648, %v1963_v17  ;;  %1219 = vmatpush1.bf16.msra.mxu0 %v1958_v31 }
  0xa6   : > { %v306_v43 = vsel %vm304_vm2, %v305_v42, %v1963_v17  ;;  %v513_v44 = vsel %vm511_vm3, %v305_v42, %v1963_v17  ;;  %1332 = vmatpush1.bf16.msra.mxu1 %v1959_v28 }
  0xa7   : > { %v303_v45 = vsel %vm301_vm4, %v1961_v41, %v302_v10  ;;  %v510_v46 = vsel %vm508_vm5, %v1961_v41, %v302_v10 }
  0xa8   : > { %v307_v47 = vsel %vm300_vm6, %v303_v45, %v306_v43  ;;  %v514_v48 = vsel %vm507_vm7, %v510_v46, %v513_v44 }
  0xa9   : > { %v2401_v51 = vsel %vm298_vm8, nan, %v307_v47  ;;  %v2403_v52 = vsel %vm298_vm8, nan, %v514_v48 }
  0xaa   : > { %v1752_v54 = vpack.i.bf16 %v2401_v51, %v2403_v52  ;;  %v1965_v55 = vpop.eup %1964  ;;  %v620_v0 = vmul.f32 %v2401_v51, %v2401_v51  ;;  %v622_v58 = vmul.f32 %v2403_v52, %v2403_v52  ;;  %v626_v34 = vmul.f32 %v2403_v52, %v2401_v51 }
  0xab   : > { %v1967_v59 = vpop.eup %1966  ;;  %v408_v60 = vxor.u32 2147483648, %v1965_v55 }
  0xac   : > { %1753 = vxpose.xlu0.b32.start [1/16] %v1752_v54, 128  ;;  %v405_v61 = vxor.u32 2147483648, %v1967_v59  ;;  %v624_v56 = vsub.f32 %v620_v0, %v622_v58  ;;  %v628_v7 = vadd.f32 %v626_v34, %v626_v34 }
  0xad   : > { %v409_v62 = vsel %vm407_vm9, %v408_v60, %v1967_v59  ;;  %v617_v63 = vsel %vm615_vm10, %v408_v60, %v1967_v59 }
  0xae   : > { %v406_v3 = vsel %vm404_vm11, %v1965_v55, %v405_v61  ;;  %v614_v53 = vsel %vm612_vm12, %v1965_v55, %v405_v61  ;;  %v630_v13 = vmul.f32 %v624_v56, %v2401_v51  ;;  %v632_v57 = vmul.f32 %v628_v7, %v2403_v52 }
  0xaf   : > { %v410_v5 = vsel %vm403_vm13, %v406_v3, %v409_v62  ;;  %v618_v6 = vsel %vm611_vm14, %v614_v53, %v617_v63  ;;  %v636_v19 = vmul.f32 %v628_v7, %v2401_v51  ;;  %v638_v23 = vmul.f32 %v624_v56, %v2403_v52 }
  0xb0   : > { %v2414_v11 = vsel %vm401_vm15, nan, %v410_v5  ;;  %v2416_v12 = vsel %vm401_vm15, nan, %v618_v6  ;;  %v1756_v24 = vpack.i.bf16 %v624_v56, %v628_v7  ;;  %v634_v21 = vsub.f32 %v630_v13, %v632_v57 }
  0xb1   : > { %v1754_v1 = vpack.i.bf16 %v2414_v11, %v2416_v12  ;;  %v621_v15 = vmul.f32 %v2414_v11, %v2414_v11  ;;  %v623_v16 = vmul.f32 %v2416_v12, %v2416_v12  ;;  %v627_v18 = vmul.f32 %v2416_v12, %v2414_v11 }
  0xb2   : > { %v640_v32 = vadd.f32 %v638_v23, %v636_v19  ;;  %v642_v38 = vmul.f32 %v634_v21, %v2401_v51  ;;  %v650_v39 = vmul.f32 %v634_v21, %v2403_v52 }
  0xb3   : > { %1755 = vxpose.xlu0.b32.cont [2/16] %v1754_v1, 128  ;;  %v625_v25 = vsub.f32 %v621_v15, %v623_v16  ;;  %v629_v26 = vadd.f32 %v627_v18, %v627_v18 }
  0xb4   : > { %v1760_v37 = vpack.i.bf16 %v634_v21, %v640_v32  ;;  %v644_v41 = vmul.f32 %v640_v32, %v2403_v52  ;;  %v648_v17 = vmul.f32 %v640_v32, %v2401_v51 }
  0xb5   : > { %v1758_v30 = vpack.i.bf16 %v625_v25, %v629_v26  ;;  %v631_v20 = vmul.f32 %v625_v25, %v2414_v11  ;;  %v633_v33 = vmul.f32 %v629_v26, %v2416_v12  ;;  %v637_v35 = vmul.f32 %v629_v26, %v2414_v11 }
  0xb6   : > { %v639_v36 = vmul.f32 %v625_v25, %v2416_v12  ;;  %v646_v45 = vsub.f32 %v642_v38, %v644_v41  ;;  %v652_v46 = vadd.f32 %v650_v39, %v648_v17 }
  0xb7   : > { %1757 = vxpose.xlu0.b32.cont [3/16] %v1756_v24, 128  ;;  %v635_v4 = vsub.f32 %v631_v20, %v633_v33 }
  0xb8   : > { %v641_v40 = vadd.f32 %v639_v36, %v637_v35  ;;  %v654_v47 = vmul.f32 %v646_v45, %v2401_v51  ;;  %v656_v48 = vmul.f32 %v652_v46, %v2403_v52  ;;  %v660_v54 = vmul.f32 %v652_v46, %v2401_v51 }
  0xb9   : > { %v643_v42 = vmul.f32 %v635_v4, %v2414_v11  ;;  %v651_v43 = vmul.f32 %v635_v4, %v2416_v12  ;;  %v662_v55 = vmul.f32 %v646_v45, %v2403_v52  ;;  %v1764_v0 = vpack.i.bf16 %v646_v45, %v652_v46 }
  0xba   : > { %v645_v9 = vmul.f32 %v641_v40, %v2416_v12  ;;  %v649_v10 = vmul.f32 %v641_v40, %v2414_v11  ;;  %v1762_v44 = vpack.i.bf16 %v635_v4, %v641_v40  ;;  %v658_v59 = vsub.f32 %v654_v47, %v656_v48 }
  0xbb   : > { %1759 = vxpose.xlu0.b32.cont [4/16] %v1758_v30, 128  ;;  %v664_v60 = vadd.f32 %v662_v55, %v660_v54 }
  0xbc   : > { %v647_v49 = vsub.f32 %v643_v42, %v645_v9  ;;  %v653_v50 = vadd.f32 %v651_v43, %v649_v10  ;;  %v666_v53 = vmul.f32 %v658_v59, %v2401_v51  ;;  %v674_v8 = vmul.f32 %v658_v59, %v2403_v52 }
  0xbd   : > { %v1768_v3 = vpack.i.bf16 %v658_v59, %v664_v60  ;;  %v668_v56 = vmul.f32 %v664_v60, %v2403_v52  ;;  %v672_v7 = vmul.f32 %v664_v60, %v2401_v51 }
  0xbe   : > { %v1766_v58 = vpack.i.bf16 %v647_v49, %v653_v50  ;;  %v655_v34 = vmul.f32 %v647_v49, %v2414_v11  ;;  %v657_v61 = vmul.f32 %v653_v50, %v2416_v12  ;;  %v661_v62 = vmul.f32 %v653_v50, %v2414_v11 }
  0xbf   : > { %1761 = vxpose.xlu0.b32.cont [5/16] %v1760_v37, 128  ;;  %v663_v63 = vmul.f32 %v647_v49, %v2416_v12  ;;  %v670_v15 = vsub.f32 %v666_v53, %v668_v56  ;;  %v676_v16 = vadd.f32 %v674_v8, %v672_v7 }
  0xc0   : > { %v659_v5 = vsub.f32 %v655_v34, %v657_v61 }
  0xc1   : > { %v665_v6 = vadd.f32 %v663_v63, %v661_v62  ;;  %v678_v18 = vmul.f32 %v670_v15, %v2401_v51  ;;  %v680_v57 = vmul.f32 %v676_v16, %v2403_v52  ;;  %v684_v24 = vmul.f32 %v676_v16, %v2401_v51 }
  0xc2   : > { %v667_v22 = vmul.f32 %v659_v5, %v2414_v11  ;;  %v675_v14 = vmul.f32 %v659_v5, %v2416_v12  ;;  %v686_v25 = vmul.f32 %v670_v15, %v2403_v52  ;;  %v1772_v26 = vpack.i.bf16 %v670_v15, %v676_v16 }
  0xc3   : > { %1763 = vxpose.xlu0.b32.cont [6/16] %v1762_v44, 128  ;;  %v669_v13 = vmul.f32 %v665_v6, %v2416_v12  ;;  %v673_v2 = vmul.f32 %v665_v6, %v2414_v11  ;;  %v1770_v1 = vpack.i.bf16 %v659_v5, %v665_v6  ;;  %v682_v29 = vsub.f32 %v678_v18, %v680_v57 }
  0xc4   : > { %v688_v31 = vadd.f32 %v686_v25, %v684_v24 }
  0xc5   : > { %v671_v19 = vsub.f32 %v667_v22, %v669_v13  ;;  %v677_v23 = vadd.f32 %v675_v14, %v673_v2  ;;  %v690_v20 = vmul.f32 %v682_v29, %v2401_v51  ;;  %v698_v36 = vmul.f32 %v682_v29, %v2403_v52 }
  0xc6   : > { %v692_v33 = vmul.f32 %v688_v31, %v2403_v52  ;;  %v696_v35 = vmul.f32 %v688_v31, %v2401_v51  ;;  %v1776_v37 = vpack.i.bf16 %v682_v29, %v688_v31 }
  0xc7   : > { %1765 = vxpose.xlu0.b32.cont [7/16] %v1764_v0, 128  ;;  %v1774_v27 = vpack.i.bf16 %v671_v19, %v677_v23  ;;  %v679_v28 = vmul.f32 %v671_v19, %v2414_v11  ;;  %v681_v30 = vmul.f32 %v677_v23, %v2416_v12  ;;  %v685_v21 = vmul.f32 %v677_v23, %v2414_v11 }
  0xc8   : > { %v687_v32 = vmul.f32 %v671_v19, %v2416_v12  ;;  %v694_v4 = vsub.f32 %v690_v20, %v692_v33  ;;  %v700_v40 = vadd.f32 %v698_v36, %v696_v35 }
  0xc9   : > { %v683_v38 = vsub.f32 %v679_v28, %v681_v30 }
  0xca   : > { %v689_v39 = vadd.f32 %v687_v32, %v685_v21  ;;  %v1780_v51 = vpack.i.bf16 %v694_v4, %v700_v40 }
  0xcb   : > { %1767 = vxpose.xlu0.b32.cont [8/16] %v1766_v58, 128  ;;  %v691_v41 = vmul.f32 %v683_v38, %v2414_v11  ;;  %v699_v10 = vmul.f32 %v683_v38, %v2416_v12 }
  0xcc   : > { %v1778_v17 = vpack.i.bf16 %v683_v38, %v689_v39  ;;  %v693_v42 = vmul.f32 %v689_v39, %v2416_v12  ;;  %v697_v9 = vmul.f32 %v689_v39, %v2414_v11 }
  0xce   : > { %v695_v43 = vsub.f32 %v691_v41, %v693_v42  ;;  %v701_v52 = vadd.f32 %v699_v10, %v697_v9 }
  0xcf   : > { %1769 = vxpose.xlu0.b32.cont [9/16] %v1768_v3, 128 }
  0xd0   : > { %v1782_v44 = vpack.i.bf16 %v695_v43, %v701_v52 }
  0xd3   : > { %1771 = vxpose.xlu0.b32.cont [10/16] %v1770_v1, 128 }
  0xd7   : > { %1773 = vxpose.xlu0.b32.cont [11/16] %v1772_v26, 128 }
  0xdb   : > { %1775 = vxpose.xlu0.b32.cont [12/16] %v1774_v27, 128 }
  0xdf   : > { %1777 = vxpose.xlu0.b32.cont [13/16] %v1776_v37, 128 }
  0xe3   : > { %1779 = vxpose.xlu0.b32.cont [14/16] %v1778_v17, 128 }
  0xe7   : > { %1781 = vxpose.xlu0.b32.cont [15/16] %v1780_v51, 128 }
  0xeb   : > { %1783 = vxpose.xlu0.b32.end [16/16] %v1782_v44, 128 }
 0x12f   : > { %v1784_v45 = vpop.trf.xlu0 }
 0x130   : > { %v1788_v46 = vunpack.i.h.bf16 %v1784_v45  ;;  %v1785_v48 = vunpack.i.l.bf16 %v1784_v45  ;;  %v848_v45 = vlaneseq }
 0x133   : > { %v1789_v47 = vpop.trf.xlu0 }
 0x134   : > { %v1793_v49 = vunpack.i.h.bf16 %v1789_v47  ;;  %v1790_v50 = vunpack.i.l.bf16 %v1789_v47 }
 0x136   : > { %v767_v54 = vpack.c.bf16 %v1790_v50, %v1785_v48  ;;  %v766_v55 = vpack.c.bf16 %v1793_v49, %v1788_v46  ;;  %v849_v46 = vshrl.u32 %v848_v45, 7  ;;  %v846_v49 = vld [vmem:[%s2668_s2] sm:$0xf] }
 0x137   : > { %v1794_v0 = vpop.trf.xlu0 }
 0x138   : > { %1220 = vmatprep.mubr.bf16.mxu0 %v767_v54  ;;  %1333 = vmatprep.mubr.bf16.mxu1 %v767_v54  ;;  %v1798_v11 = vunpack.i.h.bf16 %v1794_v0  ;;  %v1795_v12 = vunpack.i.l.bf16 %v1794_v0  ;;  %v850_v47 = vsub.s32 0, %v849_v46  ;;  %v858_v48 = vsub.s32 2, %v849_v46 }
 0x139   : > { %1221 = vmatmul.mubr.bf16.vlgmr.msra.gmra.mrb[0].mxu0 %v766_v55  ;;  %1334 = vmatmul.mubr.bf16.vlgmr.msra.gmra.mrb[0].mxu1 %v766_v55  ;;  %v854_v50 = vsub.s32 1, %v849_v46  ;;  %v862_v54 = vsub.s32 3, %v849_v46 }
 0x13a   : > { %v2478_v55 = vrot.slane %v846_v49, %v850_v47  ;;  %v2480_v0 = vrot.slane %v846_v49, %v858_v48 }
 0x13b   : > { %v1799_v58 = vpop.trf.xlu0 }
 0x13c   : > { %v1803_v59 = vunpack.i.h.bf16 %v1799_v58  ;;  %v1800_v60 = vunpack.i.l.bf16 %v1799_v58 }
 0x13e   : > { %v769_v34 = vpack.c.bf16 %v1800_v60, %v1795_v12  ;;  %v768_v61 = vpack.c.bf16 %v1803_v59, %v1798_v11  ;;  %v2482_v11 = vrot.slane %v846_v49, %v854_v50  ;;  %v2484_v12 = vrot.slane %v846_v49, %v862_v54 }
 0x13f   : > { %v1804_v62 = vpop.trf.xlu0 }
 0x140   : > { %1230 = vmatprep.mubr.bf16.mxu0 %v769_v34  ;;  %1343 = vmatprep.mubr.bf16.mxu1 %v769_v34  ;;  %v1808_v63 = vunpack.i.h.bf16 %v1804_v62  ;;  %v1805_v3 = vunpack.i.l.bf16 %v1804_v62 }
 0x141   : > { %1231 = vmatmul.mubr.bf16.gmra.mrb[4].mxu0 %v768_v61  ;;  %1344 = vmatmul.mubr.bf16.gmra.mrb[4].mxu1 %v768_v61 }
 0x143   : > { %v1809_v53 = vpop.trf.xlu0 }
 0x144   : > { %v1813_v56 = vunpack.i.h.bf16 %v1809_v53  ;;  %v1810_v5 = vunpack.i.l.bf16 %v1809_v53 }
 0x146   : > { %v771_v6 = vpack.c.bf16 %v1810_v5, %v1805_v3  ;;  %v770_v7 = vpack.c.bf16 %v1813_v56, %v1808_v63 }
 0x147   : > { %v1814_v8 = vpop.trf.xlu0 }
 0x148   : > { %1240 = vmatprep.mubr.bf16.mxu0 %v771_v6  ;;  %1353 = vmatprep.mubr.bf16.mxu1 %v771_v6  ;;  %v1818_v22 = vunpack.i.h.bf16 %v1814_v8  ;;  %v1815_v13 = vunpack.i.l.bf16 %v1814_v8 }
 0x149   : > { %1241 = vmatmul.mubr.bf16.gmra.mrb[8].mxu0 %v770_v7  ;;  %1354 = vmatmul.mubr.bf16.gmra.mrb[8].mxu1 %v770_v7 }
 0x14b   : > { %v1819_v2 = vpop.trf.xlu0 }
 0x14c   : > { %v1823_v14 = vunpack.i.h.bf16 %v1819_v2  ;;  %v1820_v1 = vunpack.i.l.bf16 %v1819_v2 }
 0x14e   : > { %v773_v15 = vpack.c.bf16 %v1820_v1, %v1815_v13  ;;  %v772_v16 = vpack.c.bf16 %v1823_v14, %v1818_v22 }
 0x14f   : > { %v1824_v18 = vpop.trf.xlu0 }
 0x150   : > { %1250 = vmatprep.mubr.bf16.mxu0 %v773_v15  ;;  %1363 = vmatprep.mubr.bf16.mxu1 %v773_v15  ;;  %v1828_v57 = vunpack.i.h.bf16 %v1824_v18  ;;  %v1825_v19 = vunpack.i.l.bf16 %v1824_v18 }
 0x151   : > { %1251 = vmatmul.mubr.bf16.gmra.mrb[12].mxu0 %v772_v16  ;;  %1364 = vmatmul.mubr.bf16.gmra.mrb[12].mxu1 %v772_v16 }
 0x153   : > { %v1829_v23 = vpop.trf.xlu0 }
 0x154   : > { %v1833_v24 = vunpack.i.h.bf16 %v1829_v23  ;;  %v1830_v25 = vunpack.i.l.bf16 %v1829_v23 }
 0x156   : > { %v775_v26 = vpack.c.bf16 %v1830_v25, %v1825_v19  ;;  %v774_v27 = vpack.c.bf16 %v1833_v24, %v1828_v57 }
 0x157   : > { %v1834_v29 = vpop.trf.xlu0 }
 0x158   : > { %1260 = vmatprep.mubr.bf16.mxu0 %v775_v26  ;;  %1373 = vmatprep.mubr.bf16.mxu1 %v775_v26  ;;  %v1838_v31 = vunpack.i.h.bf16 %v1834_v29  ;;  %v1835_v28 = vunpack.i.l.bf16 %v1834_v29 }
 0x159   : > { %1261 = vmatmul.mubr.bf16.gmra.mrb[16].mxu0 %v774_v27  ;;  %1374 = vmatmul.mubr.bf16.gmra.mrb[16].mxu1 %v774_v27 }
 0x15b   : > { %v1839_v30 = vpop.trf.xlu0 }
 0x15c   : > { %v1843_v21 = vunpack.i.h.bf16 %v1839_v30  ;;  %v1840_v32 = vunpack.i.l.bf16 %v1839_v30 }
 0x15e   : > { %v777_v20 = vpack.c.bf16 %v1840_v32, %v1835_v28  ;;  %v776_v33 = vpack.c.bf16 %v1843_v21, %v1838_v31 }
 0x15f   : > { %v1844_v35 = vpop.trf.xlu0 }
 0x160   : > { %1270 = vmatprep.mubr.bf16.mxu0 %v777_v20  ;;  %1383 = vmatprep.mubr.bf16.mxu1 %v777_v20  ;;  %v1848_v36 = vunpack.i.h.bf16 %v1844_v35  ;;  %v1845_v37 = vunpack.i.l.bf16 %v1844_v35 }
 0x161   : > { %1271 = vmatmul.mubr.bf16.gmra.mrb[20].mxu0 %v776_v33  ;;  %1384 = vmatmul.mubr.bf16.gmra.mrb[20].mxu1 %v776_v33 }
 0x163   : > { %v1849_v38 = vpop.trf.xlu0 }
 0x164   : > { %v1853_v39 = vunpack.i.h.bf16 %v1849_v38  ;;  %v1850_v4 = vunpack.i.l.bf16 %v1849_v38 }
 0x166   : > { %v779_v40 = vpack.c.bf16 %v1850_v4, %v1845_v37  ;;  %v778_v41 = vpack.c.bf16 %v1853_v39, %v1848_v36 }
 0x167   : > { %v1854_v17 = vpop.trf.xlu0 }
 0x168   : > { %1280 = vmatprep.mubr.bf16.mxu0 %v779_v40  ;;  %1393 = vmatprep.mubr.bf16.mxu1 %v779_v40  ;;  %v1858_v42 = vunpack.i.h.bf16 %v1854_v17  ;;  %v1855_v9 = vunpack.i.l.bf16 %v1854_v17 }
 0x169   : > { %1281 = vmatmul.mubr.bf16.gmra.mrb[24].mxu0 %v778_v41  ;;  %1394 = vmatmul.mubr.bf16.gmra.mrb[24].mxu1 %v778_v41 }
 0x16b   : > { %v1859_v10 = vpop.trf.xlu0 }
 0x16c   : > { %v1863_v51 = vunpack.i.h.bf16 %v1859_v10  ;;  %v1860_v43 = vunpack.i.l.bf16 %v1859_v10 }
 0x16e   : > { %v781_v52 = vpack.c.bf16 %v1860_v43, %v1855_v9  ;;  %v780_v44 = vpack.c.bf16 %v1863_v51, %v1858_v42 }
 0x170   : > { %1290 = vmatprep.mubr.bf16.mxu0 %v781_v52  ;;  %1403 = vmatprep.mubr.bf16.mxu1 %v781_v52 }
 0x171   : > { %1291 = vmatmul.mubr.bf16.gmra.mrb[28].mxu0 %v780_v44  ;;  %1404 = vmatmul.mubr.bf16.gmra.mrb[28].mxu1 %v780_v44 }
 0x20c   : > { %v1222_v58 = vpop.f32.mrb[0].mxu0  ;;  %v1335_v59 = vpop.f32.mrb[0].mxu1 }
 0x20d   : > { %v1223_v60 = vadd.f32 %v1222_v58, %v2478_v55  ;;  %v1336_v34 = vadd.f32 %v1335_v59, %v2480_v0  ;;  %v1224_v61 = vpop.f32.mrb[1].mxu0  ;;  %v1337_v62 = vpop.f32.mrb[1].mxu1 }
 0x20e   : > { %v1225_v63 = vadd.f32 %v1224_v61, %v2482_v11  ;;  %v1338_v3 = vadd.f32 %v1337_v62, %v2484_v12  ;;  %v1226_v53 = vpop.f32.mrb[2].mxu0  ;;  %v1339_v56 = vpop.f32.mrb[2].mxu1 }
 0x20f   : > { %1414 = vst [vmem:[%s2490_s9] sm:$0xff] %v1223_v60  ;;  %1416 = vst [vmem:[%s2490_s9 + $0x10] sm:$0xff] %v1336_v34  ;;  %v1227_v5 = vadd.f32 %v1226_v53, %v2478_v55  ;;  %v1340_v6 = vadd.f32 %v1339_v56, %v2480_v0  ;;  %v1228_v7 = vpop.f32.mrb[3].mxu0  ;;  %v1341_v8 = vpop.f32.mrb[3].mxu1 }
 0x210   : > { %1415 = vst [vmem:[%s2490_s9 + $0x8] sm:$0xff] %v1225_v63  ;;  %1417 = vst [vmem:[%s2490_s9 + $0x18] sm:$0xff] %v1338_v3  ;;  %v1229_v22 = vadd.f32 %v1228_v7, %v2482_v11  ;;  %v1342_v13 = vadd.f32 %v1341_v8, %v2484_v12 }
 0x211   : > { %1418 = vst [vmem:[%s2490_s9 + $0x20] sm:$0xff] %v1227_v5  ;;  %1420 = vst [vmem:[%s2490_s9 + $0x30] sm:$0xff] %v1340_v6 }
 0x212   : > { %1419 = vst [vmem:[%s2490_s9 + $0x28] sm:$0xff] %v1229_v22  ;;  %1421 = vst [vmem:[%s2490_s9 + $0x38] sm:$0xff] %v1342_v13 }
 0x214   : > { %v1232_v2 = vpop.f32.mrb[4].mxu0  ;;  %v1345_v14 = vpop.f32.mrb[4].mxu1 }
 0x215   : > { %v1233_v1 = vadd.f32 %v1232_v2, %v2478_v55  ;;  %v1346_v15 = vadd.f32 %v1345_v14, %v2480_v0  ;;  %v1234_v16 = vpop.f32.mrb[5].mxu0  ;;  %v1347_v18 = vpop.f32.mrb[5].mxu1 }
 0x216   : > { %v1235_v57 = vadd.f32 %v1234_v16, %v2482_v11  ;;  %v1348_v19 = vadd.f32 %v1347_v18, %v2484_v12  ;;  %v1236_v23 = vpop.f32.mrb[6].mxu0  ;;  %v1349_v24 = vpop.f32.mrb[6].mxu1 }
 0x217   : > { %1422 = vst [vmem:[%s2490_s9 + $0x40] sm:$0xff] %v1233_v1  ;;  %1424 = vst [vmem:[%s2490_s9 + $0x50] sm:$0xff] %v1346_v15  ;;  %v1237_v25 = vadd.f32 %v1236_v23, %v2478_v55  ;;  %v1350_v26 = vadd.f32 %v1349_v24, %v2480_v0  ;;  %v1238_v27 = vpop.f32.mrb[7].mxu0  ;;  %v1351_v29 = vpop.f32.mrb[7].mxu1 }
 0x218   : > { %1423 = vst [vmem:[%s2490_s9 + $0x48] sm:$0xff] %v1235_v57  ;;  %1425 = vst [vmem:[%s2490_s9 + $0x58] sm:$0xff] %v1348_v19  ;;  %v1239_v31 = vadd.f32 %v1238_v27, %v2482_v11  ;;  %v1352_v28 = vadd.f32 %v1351_v29, %v2484_v12 }
 0x219   : > { %1426 = vst [vmem:[%s2490_s9 + $0x60] sm:$0xff] %v1237_v25  ;;  %1428 = vst [vmem:[%s2490_s9 + $0x70] sm:$0xff] %v1350_v26 }
 0x21a   : > { %1427 = vst [vmem:[%s2490_s9 + $0x68] sm:$0xff] %v1239_v31  ;;  %1429 = vst [vmem:[%s2490_s9 + $0x78] sm:$0xff] %v1352_v28 }
 0x21c   : > { %v1242_v30 = vpop.f32.mrb[8].mxu0  ;;  %v1355_v21 = vpop.f32.mrb[8].mxu1 }
 0x21d   : > { %v1243_v32 = vadd.f32 %v1242_v30, %v2478_v55  ;;  %v1356_v20 = vadd.f32 %v1355_v21, %v2480_v0  ;;  %v1244_v33 = vpop.f32.mrb[9].mxu0  ;;  %v1357_v35 = vpop.f32.mrb[9].mxu1 }
 0x21e   : > { %v1245_v36 = vadd.f32 %v1244_v33, %v2482_v11  ;;  %v1358_v37 = vadd.f32 %v1357_v35, %v2484_v12  ;;  %v1246_v38 = vpop.f32.mrb[10].mxu0  ;;  %v1359_v39 = vpop.f32.mrb[10].mxu1 }
 0x21f   : > { %1430 = vst [vmem:[%s2490_s9 + $0x80] sm:$0xff] %v1243_v32  ;;  %1432 = vst [vmem:[%s2490_s9 + $0x90] sm:$0xff] %v1356_v20  ;;  %v1247_v4 = vadd.f32 %v1246_v38, %v2478_v55  ;;  %v1360_v40 = vadd.f32 %v1359_v39, %v2480_v0  ;;  %v1248_v41 = vpop.f32.mrb[11].mxu0  ;;  %v1361_v17 = vpop.f32.mrb[11].mxu1 }
 0x220   : > { %1431 = vst [vmem:[%s2490_s9 + $0x88] sm:$0xff] %v1245_v36  ;;  %1433 = vst [vmem:[%s2490_s9 + $0x98] sm:$0xff] %v1358_v37  ;;  %v1249_v42 = vadd.f32 %v1248_v41, %v2482_v11  ;;  %v1362_v9 = vadd.f32 %v1361_v17, %v2484_v12 }
 0x221   : > { %1434 = vst [vmem:[%s2490_s9 + $0xa0] sm:$0xff] %v1247_v4  ;;  %1436 = vst [vmem:[%s2490_s9 + $0xb0] sm:$0xff] %v1360_v40 }
 0x222   : > { %1435 = vst [vmem:[%s2490_s9 + $0xa8] sm:$0xff] %v1249_v42  ;;  %1437 = vst [vmem:[%s2490_s9 + $0xb8] sm:$0xff] %v1362_v9 }
 0x224   : > { %v1252_v10 = vpop.f32.mrb[12].mxu0  ;;  %v1365_v51 = vpop.f32.mrb[12].mxu1 }
 0x225   : > { %v1253_v43 = vadd.f32 %v1252_v10, %v2478_v55  ;;  %v1366_v52 = vadd.f32 %v1365_v51, %v2480_v0  ;;  %v1254_v44 = vpop.f32.mrb[13].mxu0  ;;  %v1367_v45 = vpop.f32.mrb[13].mxu1 }
 0x226   : > { %v1255_v46 = vadd.f32 %v1254_v44, %v2482_v11  ;;  %v1368_v47 = vadd.f32 %v1367_v45, %v2484_v12  ;;  %v1256_v48 = vpop.f32.mrb[14].mxu0  ;;  %v1369_v49 = vpop.f32.mrb[14].mxu1 }
 0x227   : > { %1438 = vst [vmem:[%s2490_s9 + $0xc0] sm:$0xff] %v1253_v43  ;;  %1440 = vst [vmem:[%s2490_s9 + $0xd0] sm:$0xff] %v1366_v52  ;;  %v1257_v50 = vadd.f32 %v1256_v48, %v2478_v55  ;;  %v1370_v54 = vadd.f32 %v1369_v49, %v2480_v0  ;;  %v1258_v58 = vpop.f32.mrb[15].mxu0  ;;  %v1371_v59 = vpop.f32.mrb[15].mxu1 }
 0x228   : > { %1439 = vst [vmem:[%s2490_s9 + $0xc8] sm:$0xff] %v1255_v46  ;;  %1441 = vst [vmem:[%s2490_s9 + $0xd8] sm:$0xff] %v1368_v47  ;;  %v1259_v60 = vadd.f32 %v1258_v58, %v2482_v11  ;;  %v1372_v34 = vadd.f32 %v1371_v59, %v2484_v12 }
 0x229   : > { %1442 = vst [vmem:[%s2490_s9 + $0xe0] sm:$0xff] %v1257_v50  ;;  %1444 = vst [vmem:[%s2490_s9 + $0xf0] sm:$0xff] %v1370_v54 }
 0x22a   : > { %1443 = vst [vmem:[%s2490_s9 + $0xe8] sm:$0xff] %v1259_v60  ;;  %1445 = vst [vmem:[%s2490_s9 + $0xf8] sm:$0xff] %v1372_v34 }
 0x22c   : > { %v1262_v61 = vpop.f32.mrb[16].mxu0  ;;  %v1375_v62 = vpop.f32.mrb[16].mxu1 }
 0x22d   : > { %v1263_v63 = vadd.f32 %v1262_v61, %v2478_v55  ;;  %v1376_v3 = vadd.f32 %v1375_v62, %v2480_v0  ;;  %v1264_v53 = vpop.f32.mrb[17].mxu0  ;;  %v1377_v56 = vpop.f32.mrb[17].mxu1 }
 0x22e   : > { %v1265_v5 = vadd.f32 %v1264_v53, %v2482_v11  ;;  %v1378_v6 = vadd.f32 %v1377_v56, %v2484_v12  ;;  %v1266_v7 = vpop.f32.mrb[18].mxu0  ;;  %v1379_v8 = vpop.f32.mrb[18].mxu1 }
 0x22f   : > { %1446 = vst [vmem:[%s2490_s9 + $0x100] sm:$0xff] %v1263_v63  ;;  %1448 = vst [vmem:[%s2490_s9 + $0x110] sm:$0xff] %v1376_v3  ;;  %v1267_v22 = vadd.f32 %v1266_v7, %v2478_v55  ;;  %v1380_v13 = vadd.f32 %v1379_v8, %v2480_v0  ;;  %v1268_v2 = vpop.f32.mrb[19].mxu0  ;;  %v1381_v14 = vpop.f32.mrb[19].mxu1 }
 0x230   : > { %1447 = vst [vmem:[%s2490_s9 + $0x108] sm:$0xff] %v1265_v5  ;;  %1449 = vst [vmem:[%s2490_s9 + $0x118] sm:$0xff] %v1378_v6  ;;  %v1269_v1 = vadd.f32 %v1268_v2, %v2482_v11  ;;  %v1382_v15 = vadd.f32 %v1381_v14, %v2484_v12 }
 0x231   : > { %1450 = vst [vmem:[%s2490_s9 + $0x120] sm:$0xff] %v1267_v22  ;;  %1452 = vst [vmem:[%s2490_s9 + $0x130] sm:$0xff] %v1380_v13 }
 0x232   : > { %1451 = vst [vmem:[%s2490_s9 + $0x128] sm:$0xff] %v1269_v1  ;;  %1453 = vst [vmem:[%s2490_s9 + $0x138] sm:$0xff] %v1382_v15 }
 0x234   : > { %v1272_v16 = vpop.f32.mrb[20].mxu0  ;;  %v1385_v18 = vpop.f32.mrb[20].mxu1 }
 0x235   : > { %v1273_v57 = vadd.f32 %v1272_v16, %v2478_v55  ;;  %v1386_v19 = vadd.f32 %v1385_v18, %v2480_v0  ;;  %v1274_v23 = vpop.f32.mrb[21].mxu0  ;;  %v1387_v24 = vpop.f32.mrb[21].mxu1 }
 0x236   : > { %v1275_v25 = vadd.f32 %v1274_v23, %v2482_v11  ;;  %v1388_v26 = vadd.f32 %v1387_v24, %v2484_v12  ;;  %v1276_v27 = vpop.f32.mrb[22].mxu0  ;;  %v1389_v29 = vpop.f32.mrb[22].mxu1 }
 0x237   : > { %1454 = vst [vmem:[%s2490_s9 + $0x140] sm:$0xff] %v1273_v57  ;;  %1456 = vst [vmem:[%s2490_s9 + $0x150] sm:$0xff] %v1386_v19  ;;  %v1277_v31 = vadd.f32 %v1276_v27, %v2478_v55  ;;  %v1390_v28 = vadd.f32 %v1389_v29, %v2480_v0  ;;  %v1278_v30 = vpop.f32.mrb[23].mxu0  ;;  %v1391_v21 = vpop.f32.mrb[23].mxu1 }
 0x238   : > { %1455 = vst [vmem:[%s2490_s9 + $0x148] sm:$0xff] %v1275_v25  ;;  %1457 = vst [vmem:[%s2490_s9 + $0x158] sm:$0xff] %v1388_v26  ;;  %v1279_v32 = vadd.f32 %v1278_v30, %v2482_v11  ;;  %v1392_v20 = vadd.f32 %v1391_v21, %v2484_v12 }
 0x239   : > { %1458 = vst [vmem:[%s2490_s9 + $0x160] sm:$0xff] %v1277_v31  ;;  %1460 = vst [vmem:[%s2490_s9 + $0x170] sm:$0xff] %v1390_v28 }
 0x23a   : > { %1459 = vst [vmem:[%s2490_s9 + $0x168] sm:$0xff] %v1279_v32  ;;  %1461 = vst [vmem:[%s2490_s9 + $0x178] sm:$0xff] %v1392_v20 }
 0x23c   : > { %v1282_v33 = vpop.f32.mrb[24].mxu0  ;;  %v1395_v35 = vpop.f32.mrb[24].mxu1 }
 0x23d   : > { %v1283_v36 = vadd.f32 %v1282_v33, %v2478_v55  ;;  %v1396_v37 = vadd.f32 %v1395_v35, %v2480_v0  ;;  %v1284_v38 = vpop.f32.mrb[25].mxu0  ;;  %v1397_v39 = vpop.f32.mrb[25].mxu1 }
 0x23e   : > { %v1285_v4 = vadd.f32 %v1284_v38, %v2482_v11  ;;  %v1398_v40 = vadd.f32 %v1397_v39, %v2484_v12  ;;  %v1286_v41 = vpop.f32.mrb[26].mxu0  ;;  %v1399_v17 = vpop.f32.mrb[26].mxu1 }
 0x23f   : > { %1462 = vst [vmem:[%s2490_s9 + $0x180] sm:$0xff] %v1283_v36  ;;  %1464 = vst [vmem:[%s2490_s9 + $0x190] sm:$0xff] %v1396_v37  ;;  %v1287_v42 = vadd.f32 %v1286_v41, %v2478_v55  ;;  %v1400_v9 = vadd.f32 %v1399_v17, %v2480_v0  ;;  %v1288_v10 = vpop.f32.mrb[27].mxu0  ;;  %v1401_v51 = vpop.f32.mrb[27].mxu1 }
 0x240   : > { %1463 = vst [vmem:[%s2490_s9 + $0x188] sm:$0xff] %v1285_v4  ;;  %1465 = vst [vmem:[%s2490_s9 + $0x198] sm:$0xff] %v1398_v40  ;;  %v1289_v43 = vadd.f32 %v1288_v10, %v2482_v11  ;;  %v1402_v52 = vadd.f32 %v1401_v51, %v2484_v12 }
 0x241   : > { %1466 = vst [vmem:[%s2490_s9 + $0x1a0] sm:$0xff] %v1287_v42  ;;  %1468 = vst [vmem:[%s2490_s9 + $0x1b0] sm:$0xff] %v1400_v9 }
 0x242   : > { %1467 = vst [vmem:[%s2490_s9 + $0x1a8] sm:$0xff] %v1289_v43  ;;  %1469 = vst [vmem:[%s2490_s9 + $0x1b8] sm:$0xff] %v1402_v52 }
 0x244   : > { %v1292_v44 = vpop.f32.mrb[28].mxu0  ;;  %v1405_v45 = vpop.f32.mrb[28].mxu1 }
 0x245   : > { %v1293_v46 = vadd.f32 %v1292_v44, %v2478_v55  ;;  %v1406_v47 = vadd.f32 %v1405_v45, %v2480_v0  ;;  %v1294_v48 = vpop.f32.mrb[29].mxu0  ;;  %v1407_v49 = vpop.f32.mrb[29].mxu1 }
 0x246   : > { %v1295_v50 = vadd.f32 %v1294_v48, %v2482_v11  ;;  %v1408_v54 = vadd.f32 %v1407_v49, %v2484_v12  ;;  %v1296_v58 = vpop.f32.mrb[30].mxu0  ;;  %v1409_v59 = vpop.f32.mrb[30].mxu1 }
 0x247   : > { %1470 = vst [vmem:[%s2490_s9 + $0x1c0] sm:$0xff] %v1293_v46  ;;  %1472 = vst [vmem:[%s2490_s9 + $0x1d0] sm:$0xff] %v1406_v47  ;;  %v1297_v60 = vadd.f32 %v1296_v58, %v2478_v55  ;;  %v1410_v34 = vadd.f32 %v1409_v59, %v2480_v0  ;;  %v1298_v61 = vpop.f32.mrb[31].mxu0  ;;  %v1411_v62 = vpop.f32.mrb[31].mxu1 }
 0x248   : > { %1471 = vst [vmem:[%s2490_s9 + $0x1c8] sm:$0xff] %v1295_v50  ;;  %1473 = vst [vmem:[%s2490_s9 + $0x1d8] sm:$0xff] %v1408_v54  ;;  %v1299_v63 = vadd.f32 %v1298_v61, %v2482_v11  ;;  %v1412_v55 = vadd.f32 %v1411_v62, %v2484_v12 }
 0x249   : > { %1474 = vst [vmem:[%s2490_s9 + $0x1e0] sm:$0xff] %v1297_v60  ;;  %1476 = vst [vmem:[%s2490_s9 + $0x1f0] sm:$0xff] %v1410_v34 }
 0x24a   : > { %1475 = vst [vmem:[%s2490_s9 + $0x1e8] sm:$0xff] %v1299_v63  ;;  %1477 = vst [vmem:[%s2490_s9 + $0x1f8] sm:$0xff] %v1412_v55 }
 0x24b   : > { %2039 = shalt.err (!%p2036_p11)
}
 0x24c   : > { %s2040_s10 = scalar_lea.hbm %s2613_s30, 8192  ;;  %s2044_s20 = scalar_lea.hbm %s2669_s3, 24576 }
 0x24d   : > { %p2041_p13 = scmp.ne.s32.totalorder %s2613_s30, %s2040_s10  ;;  %p2045_p12 = scmp.lt.u32.totalorder %s2613_s30, %s2669_s3 }
 0x24e   : > { %p2046_p0 = scmp.lt.u32.totalorder %s2044_s20, %s2040_s10  ;;  %p2048_p7 = scmp.lt.u32.totalorder %s2040_s10, %s2613_s30 }
 0x24f   : > { %p2042_p2 = pnand %p2041_p13, %p2689_p9 }
 0x250   : > { %p2047_p4 = por %p2046_p0, %p2045_p12 }
 0x251   : > { %p2043_p6 = pneg %p2042_p2 }
 0x252   : > { %p2049_p10 = por %p2048_p7, %p2047_p4 }
 0x254   : > { %p2050_p1 = pnand %p2049_p10, %p2043_p6 }
 0x256   : > { %2053 = shalt.err (!%p2050_p1)
}
 0x257   : > { %s2112_s4 = smov 512   ;;  %s2113_s9 = smov 32  }
 0x258   : > { %1688 = dma.vmem_to_hbm [thread:$0]  (%p2689_p9), %s2615_s29, 8192, %s2613_s30, %s1479_s5, %s2112_s4, %s2112_s4, %s2113_s9  }
 0x259 PF: > { %p1705_p3 = scmp.ge.s32.totalorder %s2096_s15, 2  ;;  %s1508_s22 = sand.u32 1, %s2084_s12  }
 0x25a   : > { %p2690_p8 = scmp.ne.s32.totalorder %s2677_s25, 0  ;;  %s1509_s16 = scalar_lea.sflag [#allocation4], %s1508_s22 }
 0x25c   : > { %p1699_p5 = pnand %p1705_p3, %p2690_p8 }
 0x25e   : > { %2079 = dma.done.wait (!%p1699_p5), %s1509_s16, 8192  }
 0x25f   : > { %2081 = vsyncadd (!%p1699_p5), %s1509_s16, 4294959104  ;;  %p17_p11 = scmp.ge.s32.totalorder %s2159_s18, 5   ;;  %s2691_s12 = smov %s2088_s13 }
 0x260   : > { %s2692_s13 = smov %s2092_s14  ;;  %s2693_s14 = smov %s2171_s21 }
 0x261   : > { %s2694_s15 = smov %s2159_s18  ;;  %19 = sbr.rel (!%p17_p11) target bundleno = 6 (0x6), region = 81 }
 0x268   :  { %1514 = vsyncpa [#allocation3], 1 }
 0x269   :  { %1516 = vsyncpa [#allocation3 + $0x1], 1 }
 0x26a   :  { %1517 = vsyncpa [#allocation6], 1 }
 0x26b   :  { %1518 = vsyncpa [#allocation4], 1 }
 0x26c   :  { %1520 = vsyncpa [#allocation4 + $0x1], 1 }

// kernel: tpu_custom_call.1
= control target key start
LH: loop header
LB: loop body
LE: loop exit
PB: predicated region body
PF: predicated region fallthrough
CT: control target
= control target key end

     0   :  { %8 = vsyncpa [#allocation3], 0  ;;  %s2666_s0 = inlined_call_operand.hbm [shape: f32[16,384], index: 0, kind: input, shape index: {}]   ;;  %s2667_s1 = inlined_call_operand.hbm [shape: bf16[256,512], index: 1, kind: input, shape index: {}]   ;;  %s2668_s2 = inlined_call_operand.vmem [shape: f32[1,512], index: 2, kind: input, shape index: {}]   ;;  %s2669_s3 = inlined_call_operand.hbm [shape: f32[384,512], index: 3, kind: output, shape index: {}]  }
   0x1   :  { %10 = vsyncpa [#allocation3 + $0x1], 0 }
   0x2   :  { %11 = vsyncpa [#allocation6], 0 }
   0x3   :  { %12 = vsyncpa [#allocation4], 0 }
   0x4   :  { %14 = vsyncpa [#allocation4 + $0x1], 0  ;;  %s2134_s12 = smov 0   ;;  %s2136_s13 = smov 0  }
   0x5   :  { %s2138_s14 = smov 0   ;;  %s2140_s15 = smov 0  }
   0x6 LB: > { %s2155_s16 = sadd.s32 4294967295, %s2096_s15   ;;  %s1576_s17 = sadd.s32 4294967294, %s2096_s15   ;;  %s2096_s15 = sphi %s2140_s15, %s2694_s15   ;;  %s2092_s14 = sphi %s2138_s14, %s2693_s14   ;;  %s2088_s13 = sphi %s2136_s13, %s2692_s13   ;;  %s2084_s12 = sphi %s2134_s12, %s2691_s12  }
   0x7   : > { %s2159_s18 = sadd.s32 1, %s2096_s15   ;;  %s27_s19 = sadd.s32 1, %s2092_s14 }
   0x8   : > { %s24_s20 = ssub.s32 %s2096_s15, %s2159_s18  ;;  %p34_p0 = scmp.ne.s32.totalorder %s2092_s14, %s2088_s13 }
   0x9   : > { %p25_p1 = scmp.eq.s32.totalorder %s24_s20, 0  ;;  %p35_p2 = scmp.eq.s32.totalorder %s2096_s15, 0 }
   0xa   : > { %p40_p3 = scmp.ne.s32.totalorder %s2088_s13, %s2084_s12  ;;  %p2670_p4 = scmp.eq.s32.totalorder %s2155_s16, 0 }
   0xb   : > { %s2171_s21 = scalar_select %p25_p1, %s2092_s14, %s27_s19  }
   0xc   : > { %p2173_p5 = por %p35_p2, %p34_p0  ;;  %p2179_p6 = por %p2670_p4, %p40_p3 }
   0xd   : > { %p106_p7 = scmp.eq.s32.totalorder %s2155_s16, 2  ;;  %p112_p8 = scmp.eq.s32.totalorder %s1576_s17, 2 }
   0xe   : > { %s2674_s22 = scalar_select %p2173_p5, 1, 0 }
   0xf   : > { %s2675_s23 = scalar_select %p2179_p6, 1, 0 }
  0x10   : > { %p1577_p9 = scmp.ge.s32.totalorder %s2096_s15, 1  ;;  %p119_p10 = scmp.lt.s32.totalorder %s2096_s15, 4 }
  0x11   : > { %p2186_p11 = por %p106_p7, %p34_p0  ;;  %p2190_p12 = por %p112_p8, %p40_p3 }
  0x12   : > { %p2194_p13 = pnand %p1577_p9, %p119_p10  ;;  %s2098_s27 = smov [#allocation5]  }
  0x13   : > { %s2676_s24 = scalar_select %p2186_p11, 1, 0 }
  0x14   : > { %s2677_s25 = scalar_select %p2190_p12, 1, 0 }
  0x15   : > { %s2678_s26 = scalar_select %p2194_p13, 1, 0 }
  0x16   : > { %p1690_p1 = pneg %p2194_p13  ;;  %s131_s28 = sshll.u32 %s2098_s27, 4  ;;  %s132_s28 = int_to_ptr.vmem [resolvable:$true] %s131_s28 }
  0x17   : > { %s148_s30 = sand.u32 1, %s2092_s14   ;;  %s1968_s6 = scalar_lea.hbm %s2667_s1, 8192 }
  0x18   : > { %p2202_p2 = pnand %p1690_p1, %p2670_p4  ;;  %p1969_p3 = scmp.ne.s32.totalorder %s2667_s1, %s1968_s6 }
  0x19   : > { %p1975_p10 = scmp.lt.u32.totalorder %s1968_s6, %s2667_s1 }
  0x1a   : > { %p1970_p7 = pneg %p2202_p2 }
  0x1c   : > { %p1971_p8 = pnand %p1970_p7, %p1969_p3 }
  0x1e   : > { %p1972_p9 = pneg %p1971_p8 }
  0x20   : > { %p1977_p1 = pnand %p1975_p10, %p1972_p9 }
  0x22   : > { %1980 = shalt.err (!%p1977_p1)
}
  0x23   : > { %s1981_s11 = scalar_lea.vmem %s132_s28, 8192  ;;  %p1989_p11 = scmp.lt.s32.totalorder %s132_s28, %s132_s28 }
  0x24   : > { %p1982_p4 = scmp.ne.s32.totalorder %s132_s28, %s1981_s11  ;;  %p1990_p6 = scmp.lt.s32.totalorder %s1981_s11, %s1981_s11 }
  0x26   : > { %p1984_p0 = pnand %p1982_p4, %p1970_p7  ;;  %p1991_p13 = por %p1990_p6, %p1989_p11 }
  0x28   : > { %p1985_p12 = pneg %p1984_p0 }
  0x2a   : > { %p1992_p5 = pnand %p1991_p13, %p1985_p12 }
  0x2c   : > { %1995 = shalt.err (!%p1992_p5)
}
  0x2d   : > { %s2099_s17 = smov 256   ;;  %s2100_s19 = smov 16  }
  0x2e   : > { %1693 = dma.hbm_to_vmem [thread:$0]  (!%p2202_p2), %s2667_s1, 8192, %s132_s28, [#allocation6], %s2099_s17, %s2099_s17, %s2100_s19  }
  0x2f   : > { %p2680_p3 = scmp.ne.s32.totalorder %s2674_s22, 0  ;;  %p2681_p8 = scmp.lt.s32.totalorder %s2096_s15, 3 }
  0x30   : > { %s1580_s5 = sshll.u32 %s148_s30, 4  ;;  %s1581_s6 = sshll.u32 %s2096_s15, 7 }
  0x31   : > { %p2228_p4 = pnand %p2681_p8, %p2680_p3  ;;  %s2236_s9 = scalar_lea.hbm %s2666_s0, %s1581_s6 }
  0x32   : > { %s152_s28 = scalar_lea.vmem [#allocation2], %s1580_s5  ;;  %s2240_s29 = scalar_lea.sflag [#allocation3], %s148_s30 }
  0x33   : > { %s158_s22 = sshll.u32 %s152_s28, 4  ;;  %s1996_s10 = scalar_lea.hbm %s2236_s9, 256  ;;  %s2238_s22 = int_to_ptr.vmem [resolvable:$true] %s158_s22 }
  0x34   : > { %p1997_p5 = scmp.ne.s32.totalorder %s2236_s9, %s1996_s10  ;;  %p1998_p6 = pneg %p2228_p4 }
  0x35   : > { %s2001_s19 = scalar_lea.hbm %s2666_s0, 768  ;;  %p2002_p13 = scmp.lt.u32.totalorder %s2236_s9, %s2666_s0 }
  0x36   : > { %p1999_p11 = pnand %p1998_p6, %p1997_p5  ;;  %p2003_p2 = scmp.lt.u32.totalorder %s2001_s19, %s1996_s10 }
  0x37   : > { %p2005_p7 = scmp.lt.u32.totalorder %s1996_s10, %s2236_s9 }
  0x38   : > { %p2000_p12 = pneg %p1999_p11  ;;  %p2004_p0 = por %p2003_p2, %p2002_p13 }
  0x3a   : > { %p2006_p9 = por %p2005_p7, %p2004_p0 }
  0x3c   : > { %p2007_p10 = pnand %p2006_p9, %p2000_p12 }
  0x3e   : > { %2010 = shalt.err (!%p2007_p10)
}
  0x3f   : > { %s2011_s30 = scalar_lea.vmem %s2238_s22, 256  ;;  %s2101_s5 = smov [#allocation2]  }
  0x40   : > { %p2012_p1 = scmp.ne.s32.totalorder %s2238_s22, %s2011_s30  ;;  %s2016_s6 = sshll.u32 %s2101_s5, 4  ;;  %s2017_s6 = int_to_ptr.vmem [resolvable:$false] %s2016_s6 }
  0x41   : > { %s2018_s7 = scalar_lea.vmem %s2017_s6, 512  ;;  %p2019_p5 = scmp.lt.s32.totalorder %s2238_s22, %s2017_s6 }
  0x42   : > { %p2014_p3 = pnand %p2012_p1, %p1998_p6  ;;  %p2020_p11 = scmp.lt.s32.totalorder %s2018_s7, %s2011_s30 }
  0x44   : > { %p2015_p8 = pneg %p2014_p3  ;;  %p2021_p13 = por %p2020_p11, %p2019_p5 }
  0x46   : > { %p2022_p2 = pnand %p2021_p13, %p2015_p8 }
  0x48   : > { %2025 = shalt.err (!%p2022_p2)
}
  0x49   : > { %s2102_s8 = smov 384   ;;  %s2103_s28 = smov 128  }
  0x4a   : > { %s2104_s10 = smov 8   ;;  %p2683_p6 = scmp.ne.s32.totalorder %s2678_s26, 0 }
  0x4b   : > { %1697 = dma.hbm_to_vmem [thread:$0]  (!%p2228_p4), %s2236_s9, 256, %s2238_s22, %s2240_s29, %s2102_s8, %s2103_s28, %s2104_s10  }
  0x4c   : > { %170 = sbr.rel (%p2683_p6) target bundleno = 601 (0x259), region = 32  ;;  %s2271_s11 = sand.u32 (!%p2683_p6), 1, %s2088_s13  }
  0x4d   : > { %s1583_s17 = sshll.u32 (!%p2683_p6), %s2271_s11, 4  ;;  %s173_s19 = scalar_lea.sflag (!%p2683_p6), [#allocation3], %s2271_s11 }
  0x4e   : > { %s176_s20 = scalar_lea.vmem (!%p2683_p6), [#allocation2], %s1583_s17  ;;  %p2684_p12 = scmp.ne.s32.totalorder (!%p2683_p6), %s2675_s23, 0 }
  0x53   : > { %2071 = dma.done.wait (%p2684_p12), %s173_s19, 256  }
  0x54   : > { %2073 = vsyncadd (%p2684_p12), %s173_s19, 4294967040  ;;  %p2685_p0 = scmp.eq.s32.totalorder %s2155_s16, 0 }
  0x56   : > { %2075 = dma.done.wait (%p2685_p0), [#allocation6], 8192   ;;  %p2686_p4 = pmov %p2685_p0 }
  0x57   : > { %v2283_v0 = vld [vmem:[%s176_s20] sm:$0xff]  ;;  %v2285_v1 = vld [vmem:[%s176_s20 + $0x8] sm:$0xff]  ;;  %v2105_v24 = vmov 683565275   ;;  %v2106_v26 = vmov 2475754826  }
  0x58   : > { %2077 = vsyncadd (%p2686_p4), [#allocation6], 4294959104  ;;  %v206_v2 = vand.u32 2147483647, %v2283_v0  ;;  %v209_v3 = vand.u32 2139095040, %v2283_v0  ;;  %v312_v5 = vand.u32 2139095040, %v2285_v1 }
  0x59   : > { %v309_v4 = vand.u32 2147483647, %v2285_v1  ;;  %v2107_v28 = vmov 2131351028   ;;  %v2108_v30 = vmov 2102212464  }
  0x5a   : > { %v210_v6 = vshrl.u32 %v209_v3, 23  ;;  %v213_v7 = vand.u32 8388607, %v206_v2  ;;  %v313_v8 = vshrl.u32 %v312_v5, 23  ;;  %v2109_v32 = vmov 920167782  }
  0x5b   : > { %v316_v9 = vand.u32 8388607, %v309_v4  ;;  %v2110_v40 = vmov 1326507024   ;;  %v1864_v5 = vld [vmem:[#allocation5 + $0x4] ss:$16 sps:$4 sm:$0xff]  }
  0x5c   : > { %v1586_v10 = vadd.s32 4294967169, %v210_v6  ;;  %v1590_v11 = vadd.s32 4294967169, %v313_v8  ;;  %v214_v13 = vor.u32 8388608, %v213_v7  ;;  %v1866_v6 = vld [vmem:[#allocation5 + $0xc] ss:$16 sps:$4 sm:$0xff]   ;;  %1188 = vmatprep.subr.bf16.mxu0 %v1864_v5  ;;  %vm208_vm15 = vcmp.lt.s32.totalorder %v2283_v0, 0 }
  0x5d   : > { %v317_v14 = vor.u32 8388608, %v316_v9  ;;  %v1868_v7 = vld [vmem:[#allocation5] ss:$16 sps:$4 sm:$0xff]   ;;  %1301 = vmatprep.subr.bf16.mxu1 %v1866_v6  ;;  %vm2383_vm14 = vcmp.le.f32.partialorder %v206_v2, 0.7853982  ;;  %s1585_s4 = sshll.u32 %s2271_s11, 9 }
  0x5e   : > { %v216_v12 = vadd.s32 1, %v1586_v10  ;;  %v319_v15 = vadd.s32 1, %v1590_v11  ;;  %v2295_v20 = vshll.u32 %v214_v13, 8  ;;  %v1870_v13 = vld [vmem:[#allocation5 + $0x24] ss:$16 sps:$4 sm:$0xff]   ;;  %1189 = vmatpush1.bf16.msra.mxu0 %v1868_v7  ;;  %s2490_s9 = scalar_lea.vmem [#allocation7], %s1585_s4 }
  0x5f   : > { %v2299_v22 = vshll.u32 %v317_v14, 8  ;;  %v1872_v14 = vld [vmem:[#allocation5 + $0x2c] ss:$16 sps:$4 sm:$0xff]   ;;  %1190 = vmatprep.subr.bf16.mxu0 %v1870_v13  ;;  %v1892_v6 = vld [vmem:[#allocation5 + $0x80] ss:$16 sps:$4 sm:$0xff]   ;;  %s1673_s22 = sshll.u32 %s2155_s16, 13 }
  0x60   : > { %vm217_vm0 = vcmp.gt.s32.totalorder %v216_v12, 0  ;;  %vm320_vm1 = vcmp.gt.s32.totalorder %v319_v15, 0  ;;  %v1893_v7 = vld [vmem:[#allocation5 + $0x88] ss:$16 sps:$4 sm:$0xff]   ;;  %v1932_v2 = vld [vmem:[#allocation5 + $0x16c] ss:$16 sps:$4 sm:$0xff]   ;;  %s2613_s30 = scalar_lea.hbm %s2669_s3, %s1673_s22 }
  0x61   : > { %v218_v16 = vsel %vm217_vm0, %v216_v12, 0  ;;  %v321_v19 = vsel %vm320_vm1, %v319_v15, 0  ;;  %v1869_v12 = vld [vmem:[#allocation5 + $0x8] ss:$16 sps:$4 sm:$0xff]   ;;  %vm311_vm0 = vcmp.lt.s32.totalorder %v2285_v1, 0  ;;  %s1493_s29 = sshll.u32 %s2490_s9, 4  ;;  %s2615_s29 = int_to_ptr.vmem [resolvable:$true] %s1493_s29 }
  0x62   : > { %v219_v17 = vshrl.u32 %v218_v16, 5  ;;  %v220_v18 = vand.u32 31, %v218_v16  ;;  %v2297_v21 = vand.u32 31, %v321_v19  ;;  %v2301_v34 = vshrl.u32 %v321_v19, 5  ;;  %1302 = vmatpush1.bf16.msra.mxu1 %v1869_v12  ;;  %s1479_s5 = scalar_lea.sflag [#allocation4], %s2271_s11  ;;  %s2026_s6 = scalar_lea.vmem %s2615_s29, 8192 }
  0x63   : > { %1303 = vmatprep.subr.bf16.mxu1 %v1872_v14  ;;  %vm310_vm1 = vcmp.le.f32.partialorder %v309_v4, 0.7853982  ;;  %v1946_v4 = vld [vmem:[#allocation5 + $0x1a0] ss:$16 sps:$4 sm:$0xff]   ;;  %p2027_p7 = scmp.ne.s32.totalorder %s2615_s29, %s2026_s6  ;;  %p2689_p9 = scmp.ne.s32.totalorder %s2676_s24, 0 }
  0x64   : > { %v221_v23 = vsub.s32 32, %v220_v18  ;;  %v223_v25 = vshll.u32 %v2105_v24, %v220_v18  ;;  %v226_v27 = vshll.u32 %v2106_v26, %v220_v18  ;;  %v229_v29 = vshll.u32 %v2107_v28, %v220_v18  ;;  %s2111_s7 = smov [#allocation7]  }
  0x65   : > { %v232_v31 = vshll.u32 %v2108_v30, %v220_v18  ;;  %v235_v33 = vshll.u32 %v2109_v32, %v220_v18  ;;  %vm238_vm2 = vcmp.lt.s32.totalorder %v219_v17, 1  ;;  %vm239_vm3 = vcmp.lt.s32.totalorder %v219_v17, 2  ;;  %p2028_p10 = pnand %p2027_p7, %p2689_p9  ;;  %s2030_s8 = sshll.u32 %s2111_s7, 4  ;;  %s2031_s8 = int_to_ptr.vmem [resolvable:$false] %s2030_s8 }
  0x66   : > { %v222_v35 = vshrl.u32 %v2105_v24, %v221_v23  ;;  %v224_v36 = vshrl.u32 %v2106_v26, %v221_v23  ;;  %v227_v37 = vshrl.u32 %v2107_v28, %v221_v23  ;;  %v230_v38 = vshrl.u32 %v2108_v30, %v221_v23  ;;  %s2032_s28 = scalar_lea.vmem %s2031_s8, 16384  ;;  %p2033_p3 = scmp.lt.s32.totalorder %s2615_s29, %s2031_s8 }
  0x67   : > { %v233_v39 = vshrl.u32 %v2109_v32, %v221_v23  ;;  %v236_v41 = vshrl.u32 %v2110_v40, %v221_v23  ;;  %vm241_vm4 = vcmp.lt.s32.totalorder %v219_v17, 4  ;;  %v324_v45 = vsub.s32 32, %v2297_v21  ;;  %p2029_p1 = pneg %p2028_p10  ;;  %p2034_p8 = scmp.lt.s32.totalorder %s2032_s28, %s2026_s6 }
  0x68   : > { %v225_v42 = vor.u32 %v224_v36, %v223_v25  ;;  %v228_v43 = vor.u32 %v227_v37, %v226_v27  ;;  %v231_v44 = vor.u32 %v230_v38, %v229_v29  ;;  %vm240_vm5 = vcmp.lt.s32.totalorder %v219_v17, 3  ;;  %v1875_v27 = vld [vmem:[#allocation5 + $0x28] ss:$16 sps:$4 sm:$0xff]  }
  0x69   : > { %v234_v46 = vor.u32 %v233_v39, %v232_v31  ;;  %v237_v47 = vor.u32 %v236_v41, %v235_v33  ;;  %v326_v48 = vshll.u32 %v2105_v24, %v2297_v21  ;;  %v329_v56 = vshll.u32 %v2106_v26, %v2297_v21  ;;  %1304 = vmatpush1.bf16.msra.mxu1 %v1875_v27  ;;  %v1905_v27 = vld [vmem:[#allocation5 + $0xc8] ss:$16 sps:$4 sm:$0xff]   ;;  %p2035_p5 = por %p2034_p8, %p2033_p3 }
  0x6a   : > { %v242_v49 = vsel %vm238_vm2, %v222_v35, %v225_v42  ;;  %v243_v50 = vsel %vm241_vm4, %v231_v44, 2102212464  ;;  %v246_v51 = vsel %vm238_vm2, %v225_v42, %v228_v43  ;;  %v250_v52 = vsel %vm238_vm2, %v228_v43, %v231_v44 }
  0x6b   : > { %v244_v53 = vsel %vm240_vm5, %v228_v43, %v243_v50  ;;  %v247_v54 = vsel %vm241_vm4, %v234_v46, 920167782  ;;  %v251_v55 = vsel %vm241_vm4, %v237_v47, 1326507024  ;;  %v325_v59 = vshrl.u32 %v2105_v24, %v324_v45  ;;  %v1884_v50 = vld [vmem:[#allocation5 + $0x6c] ss:$16 sps:$4 sm:$0xff]   ;;  %p2036_p11 = pnand %p2035_p5, %p2029_p1 }
  0x6c   : > { %v248_v57 = vsel %vm240_vm5, %v231_v44, %v247_v54  ;;  %v252_v58 = vsel %vm240_vm5, %v234_v46, %v251_v55  ;;  %v327_v60 = vshrl.u32 %v2106_v26, %v324_v45  ;;  %v245_v61 = vsel %vm239_vm3, %v242_v49, %v244_v53  ;;  %v1874_v26 = vld [vmem:[#allocation5 + $0x20] ss:$16 sps:$4 sm:$0xff]   ;;  %v1882_v49 = vld [vmem:[#allocation5 + $0x64] ss:$16 sps:$4 sm:$0xff]  }
  0x6d   : > { %v249_v62 = vsel %vm239_vm3, %v246_v51, %v248_v57  ;;  %v253_v63 = vsel %vm239_vm3, %v250_v52, %v252_v58  ;;  %v330_v3 = vshrl.u32 %v2107_v28, %v324_v45  ;;  %v332_v17 = vshll.u32 %v2107_v28, %v2297_v21  ;;  %v1876_v28 = vld [vmem:[#allocation5 + $0x44] ss:$16 sps:$4 sm:$0xff]   ;;  %1191 = vmatpush1.bf16.msra.mxu0 %v1874_v26  ;;  %v1880_v44 = vld [vmem:[#allocation5 + $0x40] ss:$16 sps:$4 sm:$0xff]  }
  0x6e   : > { %v2313_v8 = vmul.u32.u64.low %v2295_v20, %v253_v63  ;;  %v2314_v9 = vmul.u32.u64.high %v2295_v20, %v253_v63, %v2313_v8  ;;  %v2317_v10 = vmul.u32.u64.low %v2295_v20, %v249_v62  ;;  %v2318_v11 = vmul.u32.u64.high %v2295_v20, %v249_v62, %v2317_v10  ;;  %1192 = vmatprep.subr.bf16.mxu0 %v1876_v28  ;;  %v1886_v58 = vld [vmem:[#allocation5 + $0x60] ss:$16 sps:$4 sm:$0xff]   ;;  %v1908_v28 = vld [vmem:[#allocation5 + $0xec] ss:$16 sps:$4 sm:$0xff]  }
  0x6f   : > { %v328_v15 = vor.u32 %v327_v60, %v326_v48  ;;  %v331_v16 = vor.u32 %v330_v3, %v329_v56  ;;  %v333_v18 = vshrl.u32 %v2108_v30, %v324_v45  ;;  %v335_v19 = vshll.u32 %v2108_v30, %v2297_v21  ;;  %v1904_v26 = vld [vmem:[#allocation5 + $0xc0] ss:$16 sps:$4 sm:$0xff]  }
  0x70   : > { %v336_v23 = vshrl.u32 %v2109_v32, %v324_v45  ;;  %v338_v24 = vshll.u32 %v2109_v32, %v2297_v21  ;;  %v339_v25 = vshrl.u32 %v2110_v40, %v324_v45  ;;  %v261_v29 = vmul.u32 %v2295_v20, %v245_v61  ;;  %v1878_v32 = vld [vmem:[#allocation5 + $0x4c] ss:$16 sps:$4 sm:$0xff]   ;;  %v1881_v45 = vld [vmem:[#allocation5 + $0x48] ss:$16 sps:$4 sm:$0xff]  }
  0x71   : > { %v334_v31 = vor.u32 %v333_v18, %v332_v17  ;;  %vm341_vm6 = vcmp.lt.s32.totalorder %v2301_v34, 1  ;;  %vm342_vm7 = vcmp.lt.s32.totalorder %v2301_v34, 2  ;;  %vm263_vm8 = vc.u32 %v2314_v9, %v2317_v10  ;;  %1305 = vmatprep.subr.bf16.mxu1 %v1878_v32  ;;  %1193 = vmatpush1.bf16.msra.mxu0 %v1880_v44  ;;  %v1890_v61 = vld [vmem:[#allocation5 + $0x8c] ss:$16 sps:$4 sm:$0xff]   ;;  %v1900_v18 = vld [vmem:[#allocation5 + $0xc4] ss:$16 sps:$4 sm:$0xff]  }
  0x72   : > { %v264_v30 = vadd.s32 1, %v2318_v11  ;;  %v337_v21 = vor.u32 %v336_v23, %v335_v19  ;;  %vm343_vm9 = vcmp.lt.s32.totalorder %v2301_v34, 3  ;;  %v340_v20 = vor.u32 %v339_v25, %v338_v24  ;;  %1306 = vmatpush1.bf16.msra.mxu1 %v1881_v45  ;;  %1194 = vmatprep.subr.bf16.mxu0 %v1882_v49  ;;  %v1902_v19 = vld [vmem:[#allocation5 + $0xcc] ss:$16 sps:$4 sm:$0xff]   ;;  %v1916_v44 = vld [vmem:[#allocation5 + $0x100] ss:$16 sps:$4 sm:$0xff]  }
  0x73   : > { %vm344_vm10 = vcmp.lt.s32.totalorder %v2301_v34, 4  ;;  %v345_v33 = vsel %vm341_vm6, %v325_v59, %v328_v15  ;;  %v349_v35 = vsel %vm341_vm6, %v328_v15, %v331_v16  ;;  %v353_v39 = vsel %vm341_vm6, %v331_v16, %v334_v31  ;;  %v1887_v59 = vld [vmem:[#allocation5 + $0x68] ss:$16 sps:$4 sm:$0xff]   ;;  %1307 = vmatprep.subr.bf16.mxu1 %v1884_v50  ;;  %v1888_v34 = vld [vmem:[#allocation5 + $0x84] ss:$16 sps:$4 sm:$0xff]  }
  0x74   : > { %v265_v36 = vsel %vm263_vm8, %v264_v30, %v2318_v11  ;;  %v346_v37 = vsel %vm344_vm10, %v334_v31, 2102212464  ;;  %v350_v38 = vsel %vm344_vm10, %v337_v21, 920167782  ;;  %v354_v43 = vsel %vm344_vm10, %v340_v20, 1326507024 }
  0x75   : > { %v266_v40 = vadd.s32 %v265_v36, %v261_v29  ;;  %v347_v41 = vsel %vm343_vm9, %v331_v16, %v346_v37  ;;  %v351_v42 = vsel %vm343_vm9, %v334_v31, %v350_v38  ;;  %v355_v48 = vsel %vm343_vm9, %v337_v21, %v354_v43  ;;  %1195 = vmatpush1.bf16.msra.mxu0 %v1886_v58  ;;  %v1896_v11 = vld [vmem:[#allocation5 + $0xac] ss:$16 sps:$4 sm:$0xff]   ;;  %v1898_v15 = vld [vmem:[#allocation5 + $0xa0] ss:$16 sps:$4 sm:$0xff]   ;;  %v1899_v16 = vld [vmem:[#allocation5 + $0xa8] ss:$16 sps:$4 sm:$0xff]  }
  0x76   : > { %v348_v46 = vsel %vm342_vm7, %v345_v33, %v347_v41  ;;  %v352_v47 = vsel %vm342_vm7, %v349_v35, %v351_v42  ;;  %v356_v52 = vsel %vm342_vm7, %v353_v39, %v355_v48  ;;  %1308 = vmatpush1.bf16.msra.mxu1 %v1887_v59  ;;  %1196 = vmatprep.subr.bf16.mxu0 %v1888_v34  ;;  %v1906_v31 = vld [vmem:[#allocation5 + $0xe4] ss:$16 sps:$4 sm:$0xff]   ;;  %v1910_v36 = vld [vmem:[#allocation5 + $0xe0] ss:$16 sps:$4 sm:$0xff]   ;;  %v1911_v37 = vld [vmem:[#allocation5 + $0xe8] ss:$16 sps:$4 sm:$0xff]   ;;  %vm298_vm8 = vweird.f32 %v2283_v0 }
  0x77   : > { %v267_v51 = vadd.s32 536870912, %v266_v40  ;;  %v2352_v53 = vmul.u32.u64.low %v2299_v22, %v352_v47  ;;  %v2353_v54 = vmul.u32.u64.high %v2299_v22, %v352_v47, %v2352_v53  ;;  %v364_v60 = vmul.u32 %v2299_v22, %v348_v46  ;;  %1309 = vmatprep.subr.bf16.mxu1 %v1890_v61  ;;  %v1912_v39 = vld [vmem:[#allocation5 + $0x104] ss:$16 sps:$4 sm:$0xff]   ;;  %v1917_v45 = vld [vmem:[#allocation5 + $0x108] ss:$16 sps:$4 sm:$0xff]  }
  0x78   : > { %v2357_v55 = vmul.u32.u64.low %v2299_v22, %v356_v52  ;;  %v2358_v56 = vmul.u32.u64.high %v2299_v22, %v356_v52, %v2357_v55  ;;  %v1894_v22 = vld [vmem:[#allocation5 + $0xa4] ss:$16 sps:$4 sm:$0xff]   ;;  %v262_v30 = vadd.s32 %v2317_v10, %v2314_v9  ;;  %v1920_v48 = vld [vmem:[#allocation5 + $0x12c] ss:$16 sps:$4 sm:$0xff]   ;;  %v1922_v52 = vld [vmem:[#allocation5 + $0x120] ss:$16 sps:$4 sm:$0xff]  }
  0x79   : > { %v2360_v57 = vshrl.u32 %v267_v51, 30  ;;  %v367_v63 = vadd.s32 1, %v2353_v54  ;;  %1197 = vmatpush1.bf16.msra.mxu0 %v1892_v6  ;;  %v1918_v47 = vld [vmem:[#allocation5 + $0x124] ss:$16 sps:$4 sm:$0xff]   ;;  %v1923_v59 = vld [vmem:[#allocation5 + $0x128] ss:$16 sps:$4 sm:$0xff]  }
  0x7a   : > { %vm366_vm11 = vc.u32 %v2358_v56, %v2352_v53  ;;  %1310 = vmatpush1.bf16.msra.mxu1 %v1893_v7  ;;  %1198 = vmatprep.subr.bf16.mxu0 %v1894_v22  ;;  %v365_v51 = vadd.s32 %v2352_v53, %v2358_v56  ;;  %v1929_v22 = vld [vmem:[#allocation5 + $0x148] ss:$16 sps:$4 sm:$0xff]  }
  0x7b   : > { %v269_v62 = vshll.u32 %v2360_v57, 30  ;;  %v368_v5 = vsel %vm366_vm11, %v367_v63, %v2353_v54  ;;  %1311 = vmatprep.subr.bf16.mxu1 %v1896_v11  ;;  %v292_v55 = vsub.s32 4, %v2360_v57  ;;  %v1926_v63 = vld [vmem:[#allocation5 + $0x14c] ss:$16 sps:$4 sm:$0xff]  }
  0x7c   : > { %v369_v8 = vadd.s32 %v368_v5, %v364_v60 }
  0x7d   : > { %v270_v3 = vsub.s32 %v266_v40, %v269_v62  ;;  %1199 = vmatpush1.bf16.msra.mxu0 %v1898_v15  ;;  %v1914_v40 = vld [vmem:[#allocation5 + $0x10c] ss:$16 sps:$4 sm:$0xff]   ;;  %v1924_v62 = vld [vmem:[#allocation5 + $0x144] ss:$16 sps:$4 sm:$0xff]   ;;  %v293_v7 = vsel %vm208_vm15, %v292_v55, %v2360_v57 }
  0x7e   : > { %v370_v13 = vadd.s32 536870912, %v369_v8  ;;  %1312 = vmatpush1.bf16.msra.mxu1 %v1899_v16  ;;  %1200 = vmatprep.subr.bf16.mxu0 %v1900_v18  ;;  %v295_v16 = vsel %vm2383_vm14, 0, %v293_v7 }
  0x7f   : > { %v272_v12 = vsub.s32 0, %v270_v3  ;;  %1313 = vmatprep.subr.bf16.mxu1 %v1902_v19  ;;  %v1934_v19 = vld [vmem:[#allocation5 + $0x160] ss:$16 sps:$4 sm:$0xff]  }
  0x80   : > { %v2368_v17 = vshrl.u32 %v370_v13, 30  ;;  %v1930_v13 = vld [vmem:[#allocation5 + $0x164] ss:$16 sps:$4 sm:$0xff]  }
  0x81   : > { %v1587_v14 = vmin.u32 %v272_v12, %v270_v3  ;;  %1201 = vmatpush1.bf16.msra.mxu0 %v1904_v26 }
  0x82   : > { %v372_v24 = vshll.u32 %v2368_v17, 30  ;;  %1314 = vmatpush1.bf16.msra.mxu1 %v1905_v27  ;;  %1202 = vmatprep.subr.bf16.mxu0 %v1906_v31  ;;  %v395_v26 = vsub.s32 4, %v2368_v17  ;;  %v1938_v27 = vld [vmem:[#allocation5 + $0x18c] ss:$16 sps:$4 sm:$0xff]  }
  0x83   : > { %v274_v23 = vclz %v1587_v14  ;;  %1315 = vmatprep.subr.bf16.mxu1 %v1908_v28  ;;  %v1940_v28 = vld [vmem:[#allocation5 + $0x180] ss:$16 sps:$4 sm:$0xff]  }
  0x84   : > { %v2371_v29 = vsub.s32 %v369_v8, %v372_v24  ;;  %v1928_v8 = vld [vmem:[#allocation5 + $0x140] ss:$16 sps:$4 sm:$0xff]   ;;  %v1936_v24 = vld [vmem:[#allocation5 + $0x184] ss:$16 sps:$4 sm:$0xff]  }
  0x85   : > { %v1588_v25 = vadd.s32 4294967294, %v274_v23  ;;  %1203 = vmatpush1.bf16.msra.mxu0 %v1910_v36  ;;  %v1935_v23 = vld [vmem:[#allocation5 + $0x168] ss:$16 sps:$4 sm:$0xff]  }
  0x86   : > { %v375_v32 = vsub.s32 0, %v2371_v29  ;;  %1316 = vmatpush1.bf16.msra.mxu1 %v1911_v37  ;;  %1204 = vmatprep.subr.bf16.mxu0 %v1912_v39 }
  0x87   : > { %vm1589_vm12 = vcmp.lt.s32.totalorder %v1588_v25, 0  ;;  %1317 = vmatprep.subr.bf16.mxu1 %v1914_v40  ;;  %v1947_v40 = vld [vmem:[#allocation5 + $0x1a8] ss:$16 sps:$4 sm:$0xff]  }
  0x88   : > { %v277_v21 = vsel %vm1589_vm12, 0, %v1588_v25  ;;  %v1591_v38 = vmin.u32 %v375_v32, %v2371_v29  ;;  %v396_v32 = vsel %vm311_vm0, %v395_v26, %v2368_v17 }
  0x89   : > { %v278_v20 = vsub.s32 32, %v277_v21  ;;  %v279_v33 = vshll.u32 %v270_v3, %v277_v21  ;;  %v282_v35 = vsub.s32 4294967266, %v277_v21  ;;  %1205 = vmatpush1.bf16.msra.mxu0 %v1916_v44  ;;  %v398_v39 = vsel %vm310_vm1, 0, %v396_v32 }
  0x8a   : > { %v377_v9 = vclz %v1591_v38  ;;  %1318 = vmatpush1.bf16.msra.mxu1 %v1917_v45  ;;  %1206 = vmatprep.subr.bf16.mxu0 %v1918_v47 }
  0x8b   : > { %v280_v41 = vshrl.u32 %v262_v30, %v278_v20  ;;  %v283_v42 = vadd.s32 127, %v282_v35  ;;  %1319 = vmatprep.subr.bf16.mxu1 %v1920_v48  ;;  %v1941_v30 = vld [vmem:[#allocation5 + $0x188] ss:$16 sps:$4 sm:$0xff]   ;;  %v1942_v20 = vld [vmem:[#allocation5 + $0x1a4] ss:$16 sps:$4 sm:$0xff]   ;;  %v299_v35 = vand.u32 3, %v295_v16 }
  0x8c   : > { %v1592_v46 = vadd.s32 4294967294, %v377_v9  ;;  %v609_v9 = vadd.s32 3, %v398_v39 }
  0x8d   : > { %v281_v10 = vor.u32 %v280_v41, %v279_v33  ;;  %v284_v43 = vshll.u32 %v283_v42, 23  ;;  %1207 = vmatpush1.bf16.msra.mxu0 %v1922_v52  ;;  %v1944_v33 = vld [vmem:[#allocation5 + $0x1ac] ss:$16 sps:$4 sm:$0xff]   ;;  %vm304_vm2 = vcmp.eq.s32.totalorder %v299_v35, 2  ;;  %vm301_vm4 = vcmp.eq.s32.totalorder %v299_v35, 0 }
  0x8e   : > { %vm1593_vm13 = vcmp.lt.s32.totalorder %v1592_v46, 0  ;;  %1320 = vmatpush1.bf16.msra.mxu1 %v1923_v59  ;;  %1208 = vmatprep.subr.bf16.mxu0 %v1924_v62  ;;  %vm300_vm6 = vcmp.lt.s32.totalorder %v299_v35, 2 }
  0x8f   : > { %v285_v49 = vor.u32 4788187, %v284_v43  ;;  %v288_v50 = vcvt.s32.f32 %v281_v10  ;;  %v380_v58 = vsel %vm1593_vm13, 0, %v1592_v46  ;;  %1321 = vmatprep.subr.bf16.mxu1 %v1926_v63 }
  0x90   : > { %v381_v60 = vsub.s32 32, %v380_v58  ;;  %v382_v34 = vshll.u32 %v2371_v29, %v380_v58  ;;  %v385_v61 = vsub.s32 4294967266, %v380_v58  ;;  %v505_v29 = vadd.s32 3, %v295_v16 }
  0x91   : > { %v286_v54 = vand.u32 2147483647, %v285_v49  ;;  %1209 = vmatpush1.bf16.msra.mxu0 %v1928_v8  ;;  %v402_v49 = vand.u32 3, %v398_v39  ;;  %v1948_v8 = vld [vmem:[#allocation5 + $0x1c4] ss:$16 sps:$4 sm:$0xff]  }
  0x92   : > { %v383_v56 = vshrl.u32 %v365_v51, %v381_v60  ;;  %v386_v5 = vadd.s32 127, %v385_v61  ;;  %1322 = vmatpush1.bf16.msra.mxu1 %v1929_v22  ;;  %1210 = vmatprep.subr.bf16.mxu0 %v1930_v13  ;;  %v506_v36 = vand.u32 3, %v505_v29  ;;  %v1950_v22 = vld [vmem:[#allocation5 + $0x1cc] ss:$16 sps:$4 sm:$0xff]  }
  0x93   : > { %v289_v3 = vmul.f32 %v288_v50, %v286_v54  ;;  %1323 = vmatprep.subr.bf16.mxu1 %v1932_v2  ;;  %v610_v50 = vand.u32 3, %v609_v9  ;;  %vm407_vm9 = vcmp.eq.s32.totalorder %v402_v49, 2  ;;  %vm404_vm11 = vcmp.eq.s32.totalorder %v402_v49, 0  ;;  %v1952_v2 = vld [vmem:[#allocation5 + $0x1c0] ss:$16 sps:$4 sm:$0xff]  }
  0x94   : > { %v384_v11 = vor.u32 %v383_v56, %v382_v34  ;;  %v387_v12 = vshll.u32 %v386_v5, 23  ;;  %vm511_vm3 = vcmp.eq.s32.totalorder %v506_v36, 2  ;;  %vm508_vm5 = vcmp.eq.s32.totalorder %v506_v36, 0  ;;  %v1956_v29 = vld [vmem:[#allocation5 + $0x1ec] ss:$16 sps:$4 sm:$0xff]  }
  0x95   : > { %v290_v6 = vxor.u32 2147483648, %v289_v3  ;;  %1211 = vmatpush1.bf16.msra.mxu0 %v1934_v19  ;;  %vm507_vm7 = vcmp.lt.s32.totalorder %v506_v36, 2  ;;  %vm615_vm10 = vcmp.eq.s32.totalorder %v610_v50, 2  ;;  %vm612_vm12 = vcmp.eq.s32.totalorder %v610_v50, 0 }
  0x96   : > { %v388_v18 = vor.u32 4788187, %v387_v12  ;;  %v391_v57 = vcvt.s32.f32 %v384_v11  ;;  %1324 = vmatpush1.bf16.msra.mxu1 %v1935_v23  ;;  %1212 = vmatprep.subr.bf16.mxu0 %v1936_v24  ;;  %vm403_vm13 = vcmp.lt.s32.totalorder %v402_v49, 2 }
  0x97   : > { %v291_v14 = vsel %vm208_vm15, %v290_v6, %v289_v3  ;;  %1325 = vmatprep.subr.bf16.mxu1 %v1938_v27  ;;  %vm401_vm15 = vweird.f32 %v2285_v1  ;;  %v1954_v27 = vld [vmem:[#allocation5 + $0x1e4] ss:$16 sps:$4 sm:$0xff]  }
  0x98   : > { %v294_v15 = vsel %vm2383_vm14, %v2283_v0, %v291_v14  ;;  %v389_v25 = vand.u32 2147483647, %v388_v18  ;;  %vm611_vm14 = vcmp.lt.s32.totalorder %v610_v50, 2  ;;  %v1953_v14 = vld [vmem:[#allocation5 + $0x1c8] ss:$16 sps:$4 sm:$0xff]  }
  0x99   : > { %1960 = vcosq.f32 %v294_v15  ;;  %1213 = vmatpush1.bf16.msra.mxu0 %v1940_v28  ;;  %v1959_v28 = vld [vmem:[#allocation5 + $0x1e8] ss:$16 sps:$4 sm:$0xff]  }
  0x9a   : > { %1962 = vsinq.f32 %v294_v15  ;;  %v392_v31 = vmul.f32 %v391_v57, %v389_v25  ;;  %1326 = vmatpush1.bf16.msra.mxu1 %v1941_v30  ;;  %1214 = vmatprep.subr.bf16.mxu0 %v1942_v20 }
  0x9b   : > { %1327 = vmatprep.subr.bf16.mxu1 %v1944_v33 }
  0x9c   : > { %v393_v21 = vxor.u32 2147483648, %v392_v31 }
  0x9d   : > { %1215 = vmatpush1.bf16.msra.mxu0 %v1946_v4 }
  0x9e   : > { %v394_v37 = vsel %vm311_vm0, %v393_v21, %v392_v31  ;;  %1328 = vmatpush1.bf16.msra.mxu1 %v1947_v40  ;;  %1216 = vmatprep.subr.bf16.mxu0 %v1948_v8  ;;  %v1958_v31 = vld [vmem:[#allocation5 + $0x1e0] ss:$16 sps:$4 sm:$0xff]  }
  0x9f   : > { %v397_v38 = vsel %vm310_vm1, %v2285_v1, %v394_v37  ;;  %1329 = vmatprep.subr.bf16.mxu1 %v1950_v22 }
  0xa0   : > { %1964 = vcosq.f32 %v397_v38 }
  0xa1   : > { %1966 = vsinq.f32 %v397_v38  ;;  %1217 = vmatpush1.bf16.msra.mxu0 %v1952_v2 }
  0xa2   : > { %1330 = vmatpush1.bf16.msra.mxu1 %v1953_v14  ;;  %1218 = vmatprep.subr.bf16.mxu0 %v1954_v27 }
  0xa3   : > { %v1961_v41 = vpop.eup %1960  ;;  %1331 = vmatprep.subr.bf16.mxu1 %v1956_v29 }
  0xa4   : > { %v1963_v17 = vpop.eup %1962  ;;  %v305_v42 = vxor.u32 2147483648, %v1961_v41 }
  0xa5   : > { %v302_v10 = vxor.u32 2147483648, %v1963_v17  ;;  %1219 = vmatpush1.bf16.msra.mxu0 %v1958_v31 }
  0xa6   : > { %v306_v43 = vsel %vm304_vm2, %v305_v42, %v1963_v17  ;;  %v513_v44 = vsel %vm511_vm3, %v305_v42, %v1963_v17  ;;  %1332 = vmatpush1.bf16.msra.mxu1 %v1959_v28 }
  0xa7   : > { %v303_v45 = vsel %vm301_vm4, %v1961_v41, %v302_v10  ;;  %v510_v46 = vsel %vm508_vm5, %v1961_v41, %v302_v10 }
  0xa8   : > { %v307_v47 = vsel %vm300_vm6, %v303_v45, %v306_v43  ;;  %v514_v48 = vsel %vm507_vm7, %v510_v46, %v513_v44 }
  0xa9   : > { %v2401_v51 = vsel %vm298_vm8, nan, %v307_v47  ;;  %v2403_v52 = vsel %vm298_vm8, nan, %v514_v48 }
  0xaa   : > { %v1752_v54 = vpack.i.bf16 %v2401_v51, %v2403_v52  ;;  %v1965_v55 = vpop.eup %1964  ;;  %v620_v0 = vmul.f32 %v2401_v51, %v2401_v51  ;;  %v622_v58 = vmul.f32 %v2403_v52, %v2403_v52  ;;  %v626_v34 = vmul.f32 %v2403_v52, %v2401_v51 }
  0xab   : > { %v1967_v59 = vpop.eup %1966  ;;  %v408_v60 = vxor.u32 2147483648, %v1965_v55 }
  0xac   : > { %1753 = vxpose.xlu0.b32.start [1/16] %v1752_v54, 128  ;;  %v405_v61 = vxor.u32 2147483648, %v1967_v59  ;;  %v624_v56 = vsub.f32 %v620_v0, %v622_v58  ;;  %v628_v7 = vadd.f32 %v626_v34, %v626_v34 }
  0xad   : > { %v409_v62 = vsel %vm407_vm9, %v408_v60, %v1967_v59  ;;  %v617_v63 = vsel %vm615_vm10, %v408_v60, %v1967_v59 }
  0xae   : > { %v406_v3 = vsel %vm404_vm11, %v1965_v55, %v405_v61  ;;  %v614_v53 = vsel %vm612_vm12, %v1965_v55, %v405_v61  ;;  %v630_v13 = vmul.f32 %v624_v56, %v2401_v51  ;;  %v632_v57 = vmul.f32 %v628_v7, %v2403_v52 }
  0xaf   : > { %v410_v5 = vsel %vm403_vm13, %v406_v3, %v409_v62  ;;  %v618_v6 = vsel %vm611_vm14, %v614_v53, %v617_v63  ;;  %v636_v19 = vmul.f32 %v628_v7, %v2401_v51  ;;  %v638_v23 = vmul.f32 %v624_v56, %v2403_v52 }
  0xb0   : > { %v2414_v11 = vsel %vm401_vm15, nan, %v410_v5  ;;  %v2416_v12 = vsel %vm401_vm15, nan, %v618_v6  ;;  %v1756_v24 = vpack.i.bf16 %v624_v56, %v628_v7  ;;  %v634_v21 = vsub.f32 %v630_v13, %v632_v57 }
  0xb1   : > { %v1754_v1 = vpack.i.bf16 %v2414_v11, %v2416_v12  ;;  %v621_v15 = vmul.f32 %v2414_v11, %v2414_v11  ;;  %v623_v16 = vmul.f32 %v2416_v12, %v2416_v12  ;;  %v627_v18 = vmul.f32 %v2416_v12, %v2414_v11 }
  0xb2   : > { %v640_v32 = vadd.f32 %v638_v23, %v636_v19  ;;  %v642_v38 = vmul.f32 %v634_v21, %v2401_v51  ;;  %v650_v39 = vmul.f32 %v634_v21, %v2403_v52 }
  0xb3   : > { %1755 = vxpose.xlu0.b32.cont [2/16] %v1754_v1, 128  ;;  %v625_v25 = vsub.f32 %v621_v15, %v623_v16  ;;  %v629_v26 = vadd.f32 %v627_v18, %v627_v18 }
  0xb4   : > { %v1760_v37 = vpack.i.bf16 %v634_v21, %v640_v32  ;;  %v644_v41 = vmul.f32 %v640_v32, %v2403_v52  ;;  %v648_v17 = vmul.f32 %v640_v32, %v2401_v51 }
  0xb5   : > { %v1758_v30 = vpack.i.bf16 %v625_v25, %v629_v26  ;;  %v631_v20 = vmul.f32 %v625_v25, %v2414_v11  ;;  %v633_v33 = vmul.f32 %v629_v26, %v2416_v12  ;;  %v637_v35 = vmul.f32 %v629_v26, %v2414_v11 }
  0xb6   : > { %v639_v36 = vmul.f32 %v625_v25, %v2416_v12  ;;  %v646_v45 = vsub.f32 %v642_v38, %v644_v41  ;;  %v652_v46 = vadd.f32 %v650_v39, %v648_v17 }
  0xb7   : > { %1757 = vxpose.xlu0.b32.cont [3/16] %v1756_v24, 128  ;;  %v635_v4 = vsub.f32 %v631_v20, %v633_v33 }
  0xb8   : > { %v641_v40 = vadd.f32 %v639_v36, %v637_v35  ;;  %v654_v47 = vmul.f32 %v646_v45, %v2401_v51  ;;  %v656_v48 = vmul.f32 %v652_v46, %v2403_v52  ;;  %v660_v54 = vmul.f32 %v652_v46, %v2401_v51 }
  0xb9   : > { %v643_v42 = vmul.f32 %v635_v4, %v2414_v11  ;;  %v651_v43 = vmul.f32 %v635_v4, %v2416_v12  ;;  %v662_v55 = vmul.f32 %v646_v45, %v2403_v52  ;;  %v1764_v0 = vpack.i.bf16 %v646_v45, %v652_v46 }
  0xba   : > { %v645_v9 = vmul.f32 %v641_v40, %v2416_v12  ;;  %v649_v10 = vmul.f32 %v641_v40, %v2414_v11  ;;  %v1762_v44 = vpack.i.bf16 %v635_v4, %v641_v40  ;;  %v658_v59 = vsub.f32 %v654_v47, %v656_v48 }
  0xbb   : > { %1759 = vxpose.xlu0.b32.cont [4/16] %v1758_v30, 128  ;;  %v664_v60 = vadd.f32 %v662_v55, %v660_v54 }
  0xbc   : > { %v647_v49 = vsub.f32 %v643_v42, %v645_v9  ;;  %v653_v50 = vadd.f32 %v651_v43, %v649_v10  ;;  %v666_v53 = vmul.f32 %v658_v59, %v2401_v51  ;;  %v674_v8 = vmul.f32 %v658_v59, %v2403_v52 }
  0xbd   : > { %v1768_v3 = vpack.i.bf16 %v658_v59, %v664_v60  ;;  %v668_v56 = vmul.f32 %v664_v60, %v2403_v52  ;;  %v672_v7 = vmul.f32 %v664_v60, %v2401_v51 }
  0xbe   : > { %v1766_v58 = vpack.i.bf16 %v647_v49, %v653_v50  ;;  %v655_v34 = vmul.f32 %v647_v49, %v2414_v11  ;;  %v657_v61 = vmul.f32 %v653_v50, %v2416_v12  ;;  %v661_v62 = vmul.f32 %v653_v50, %v2414_v11 }
  0xbf   : > { %1761 = vxpose.xlu0.b32.cont [5/16] %v1760_v37, 128  ;;  %v663_v63 = vmul.f32 %v647_v49, %v2416_v12  ;;  %v670_v15 = vsub.f32 %v666_v53, %v668_v56  ;;  %v676_v16 = vadd.f32 %v674_v8, %v672_v7 }
  0xc0   : > { %v659_v5 = vsub.f32 %v655_v34, %v657_v61 }
  0xc1   : > { %v665_v6 = vadd.f32 %v663_v63, %v661_v62  ;;  %v678_v18 = vmul.f32 %v670_v15, %v2401_v51  ;;  %v680_v57 = vmul.f32 %v676_v16, %v2403_v52  ;;  %v684_v24 = vmul.f32 %v676_v16, %v2401_v51 }
  0xc2   : > { %v667_v22 = vmul.f32 %v659_v5, %v2414_v11  ;;  %v675_v14 = vmul.f32 %v659_v5, %v2416_v12  ;;  %v686_v25 = vmul.f32 %v670_v15, %v2403_v52  ;;  %v1772_v26 = vpack.i.bf16 %v670_v15, %v676_v16 }
  0xc3   : > { %1763 = vxpose.xlu0.b32.cont [6/16] %v1762_v44, 128  ;;  %v669_v13 = vmul.f32 %v665_v6, %v2416_v12  ;;  %v673_v2 = vmul.f32 %v665_v6, %v2414_v11  ;;  %v1770_v1 = vpack.i.bf16 %v659_v5, %v665_v6  ;;  %v682_v29 = vsub.f32 %v678_v18, %v680_v57 }
  0xc4   : > { %v688_v31 = vadd.f32 %v686_v25, %v684_v24 }
  0xc5   : > { %v671_v19 = vsub.f32 %v667_v22, %v669_v13  ;;  %v677_v23 = vadd.f32 %v675_v14, %v673_v2  ;;  %v690_v20 = vmul.f32 %v682_v29, %v2401_v51  ;;  %v698_v36 = vmul.f32 %v682_v29, %v2403_v52 }
  0xc6   : > { %v692_v33 = vmul.f32 %v688_v31, %v2403_v52  ;;  %v696_v35 = vmul.f32 %v688_v31, %v2401_v51  ;;  %v1776_v37 = vpack.i.bf16 %v682_v29, %v688_v31 }
  0xc7   : > { %1765 = vxpose.xlu0.b32.cont [7/16] %v1764_v0, 128  ;;  %v1774_v27 = vpack.i.bf16 %v671_v19, %v677_v23  ;;  %v679_v28 = vmul.f32 %v671_v19, %v2414_v11  ;;  %v681_v30 = vmul.f32 %v677_v23, %v2416_v12  ;;  %v685_v21 = vmul.f32 %v677_v23, %v2414_v11 }
  0xc8   : > { %v687_v32 = vmul.f32 %v671_v19, %v2416_v12  ;;  %v694_v4 = vsub.f32 %v690_v20, %v692_v33  ;;  %v700_v40 = vadd.f32 %v698_v36, %v696_v35 }
  0xc9   : > { %v683_v38 = vsub.f32 %v679_v28, %v681_v30 }
  0xca   : > { %v689_v39 = vadd.f32 %v687_v32, %v685_v21  ;;  %v1780_v51 = vpack.i.bf16 %v694_v4, %v700_v40 }
  0xcb   : > { %1767 = vxpose.xlu0.b32.cont [8/16] %v1766_v58, 128  ;;  %v691_v41 = vmul.f32 %v683_v38, %v2414_v11  ;;  %v699_v10 = vmul.f32 %v683_v38, %v2416_v12 }
  0xcc   : > { %v1778_v17 = vpack.i.bf16 %v683_v38, %v689_v39  ;;  %v693_v42 = vmul.f32 %v689_v39, %v2416_v12  ;;  %v697_v9 = vmul.f32 %v689_v39, %v2414_v11 }
  0xce   : > { %v695_v43 = vsub.f32 %v691_v41, %v693_v42  ;;  %v701_v52 = vadd.f32 %v699_v10, %v697_v9 }
  0xcf   : > { %1769 = vxpose.xlu0.b32.cont [9/16] %v1768_v3, 128 }
  0xd0   : > { %v1782_v44 = vpack.i.bf16 %v695_v43, %v701_v52 }
  0xd3   : > { %1771 = vxpose.xlu0.b32.cont [10/16] %v1770_v1, 128 }
  0xd7   : > { %1773 = vxpose.xlu0.b32.cont [11/16] %v1772_v26, 128 }
  0xdb   : > { %1775 = vxpose.xlu0.b32.cont [12/16] %v1774_v27, 128 }
  0xdf   : > { %1777 = vxpose.xlu0.b32.cont [13/16] %v1776_v37, 128 }
  0xe3   : > { %1779 = vxpose.xlu0.b32.cont [14/16] %v1778_v17, 128 }
  0xe7   : > { %1781 = vxpose.xlu0.b32.cont [15/16] %v1780_v51, 128 }
  0xeb   : > { %1783 = vxpose.xlu0.b32.end [16/16] %v1782_v44, 128 }
 0x12f   : > { %v1784_v45 = vpop.trf.xlu0 }
 0x130   : > { %v1788_v46 = vunpack.i.h.bf16 %v1784_v45  ;;  %v1785_v48 = vunpack.i.l.bf16 %v1784_v45  ;;  %v848_v45 = vlaneseq }
 0x133   : > { %v1789_v47 = vpop.trf.xlu0 }
 0x134   : > { %v1793_v49 = vunpack.i.h.bf16 %v1789_v47  ;;  %v1790_v50 = vunpack.i.l.bf16 %v1789_v47 }
 0x136   : > { %v767_v54 = vpack.c.bf16 %v1790_v50, %v1785_v48  ;;  %v766_v55 = vpack.c.bf16 %v1793_v49, %v1788_v46  ;;  %v849_v46 = vshrl.u32 %v848_v45, 7  ;;  %v846_v49 = vld [vmem:[%s2668_s2] sm:$0xf] }
 0x137   : > { %v1794_v0 = vpop.trf.xlu0 }
 0x138   : > { %1220 = vmatprep.mubr.bf16.mxu0 %v767_v54  ;;  %1333 = vmatprep.mubr.bf16.mxu1 %v767_v54  ;;  %v1798_v11 = vunpack.i.h.bf16 %v1794_v0  ;;  %v1795_v12 = vunpack.i.l.bf16 %v1794_v0  ;;  %v850_v47 = vsub.s32 0, %v849_v46  ;;  %v858_v48 = vsub.s32 2, %v849_v46 }
 0x139   : > { %1221 = vmatmul.mubr.bf16.vlgmr.msra.gmra.mrb[0].mxu0 %v766_v55  ;;  %1334 = vmatmul.mubr.bf16.vlgmr.msra.gmra.mrb[0].mxu1 %v766_v55  ;;  %v854_v50 = vsub.s32 1, %v849_v46  ;;  %v862_v54 = vsub.s32 3, %v849_v46 }
 0x13a   : > { %v2478_v55 = vrot.slane %v846_v49, %v850_v47  ;;  %v2480_v0 = vrot.slane %v846_v49, %v858_v48 }
 0x13b   : > { %v1799_v58 = vpop.trf.xlu0 }
 0x13c   : > { %v1803_v59 = vunpack.i.h.bf16 %v1799_v58  ;;  %v1800_v60 = vunpack.i.l.bf16 %v1799_v58 }
 0x13e   : > { %v769_v34 = vpack.c.bf16 %v1800_v60, %v1795_v12  ;;  %v768_v61 = vpack.c.bf16 %v1803_v59, %v1798_v11  ;;  %v2482_v11 = vrot.slane %v846_v49, %v854_v50  ;;  %v2484_v12 = vrot.slane %v846_v49, %v862_v54 }
 0x13f   : > { %v1804_v62 = vpop.trf.xlu0 }
 0x140   : > { %1230 = vmatprep.mubr.bf16.mxu0 %v769_v34  ;;  %1343 = vmatprep.mubr.bf16.mxu1 %v769_v34  ;;  %v1808_v63 = vunpack.i.h.bf16 %v1804_v62  ;;  %v1805_v3 = vunpack.i.l.bf16 %v1804_v62 }
 0x141   : > { %1231 = vmatmul.mubr.bf16.gmra.mrb[4].mxu0 %v768_v61  ;;  %1344 = vmatmul.mubr.bf16.gmra.mrb[4].mxu1 %v768_v61 }
 0x143   : > { %v1809_v53 = vpop.trf.xlu0 }
 0x144   : > { %v1813_v56 = vunpack.i.h.bf16 %v1809_v53  ;;  %v1810_v5 = vunpack.i.l.bf16 %v1809_v53 }
 0x146   : > { %v771_v6 = vpack.c.bf16 %v1810_v5, %v1805_v3  ;;  %v770_v7 = vpack.c.bf16 %v1813_v56, %v1808_v63 }
 0x147   : > { %v1814_v8 = vpop.trf.xlu0 }
 0x148   : > { %1240 = vmatprep.mubr.bf16.mxu0 %v771_v6  ;;  %1353 = vmatprep.mubr.bf16.mxu1 %v771_v6  ;;  %v1818_v22 = vunpack.i.h.bf16 %v1814_v8  ;;  %v1815_v13 = vunpack.i.l.bf16 %v1814_v8 }
 0x149   : > { %1241 = vmatmul.mubr.bf16.gmra.mrb[8].mxu0 %v770_v7  ;;  %1354 = vmatmul.mubr.bf16.gmra.mrb[8].mxu1 %v770_v7 }
 0x14b   : > { %v1819_v2 = vpop.trf.xlu0 }
 0x14c   : > { %v1823_v14 = vunpack.i.h.bf16 %v1819_v2  ;;  %v1820_v1 = vunpack.i.l.bf16 %v1819_v2 }
 0x14e   : > { %v773_v15 = vpack.c.bf16 %v1820_v1, %v1815_v13  ;;  %v772_v16 = vpack.c.bf16 %v1823_v14, %v1818_v22 }
 0x14f   : > { %v1824_v18 = vpop.trf.xlu0 }
 0x150   : > { %1250 = vmatprep.mubr.bf16.mxu0 %v773_v15  ;;  %1363 = vmatprep.mubr.bf16.mxu1 %v773_v15  ;;  %v1828_v57 = vunpack.i.h.bf16 %v1824_v18  ;;  %v1825_v19 = vunpack.i.l.bf16 %v1824_v18 }
 0x151   : > { %1251 = vmatmul.mubr.bf16.gmra.mrb[12].mxu0 %v772_v16  ;;  %1364 = vmatmul.mubr.bf16.gmra.mrb[12].mxu1 %v772_v16 }
 0x153   : > { %v1829_v23 = vpop.trf.xlu0 }
 0x154   : > { %v1833_v24 = vunpack.i.h.bf16 %v1829_v23  ;;  %v1830_v25 = vunpack.i.l.bf16 %v1829_v23 }
 0x156   : > { %v775_v26 = vpack.c.bf16 %v1830_v25, %v1825_v19  ;;  %v774_v27 = vpack.c.bf16 %v1833_v24, %v1828_v57 }
 0x157   : > { %v1834_v29 = vpop.trf.xlu0 }
 0x158   : > { %1260 = vmatprep.mubr.bf16.mxu0 %v775_v26  ;;  %1373 = vmatprep.mubr.bf16.mxu1 %v775_v26  ;;  %v1838_v31 = vunpack.i.h.bf16 %v1834_v29  ;;  %v1835_v28 = vunpack.i.l.bf16 %v1834_v29 }
 0x159   : > { %1261 = vmatmul.mubr.bf16.gmra.mrb[16].mxu0 %v774_v27  ;;  %1374 = vmatmul.mubr.bf16.gmra.mrb[16].mxu1 %v774_v27 }
 0x15b   : > { %v1839_v30 = vpop.trf.xlu0 }
 0x15c   : > { %v1843_v21 = vunpack.i.h.bf16 %v1839_v30  ;;  %v1840_v32 = vunpack.i.l.bf16 %v1839_v30 }
 0x15e   : > { %v777_v20 = vpack.c.bf16 %v1840_v32, %v1835_v28  ;;  %v776_v33 = vpack.c.bf16 %v1843_v21, %v1838_v31 }
 0x15f   : > { %v1844_v35 = vpop.trf.xlu0 }
 0x160   : > { %1270 = vmatprep.mubr.bf16.mxu0 %v777_v20  ;;  %1383 = vmatprep.mubr.bf16.mxu1 %v777_v20  ;;  %v1848_v36 = vunpack.i.h.bf16 %v1844_v35  ;;  %v1845_v37 = vunpack.i.l.bf16 %v1844_v35 }
 0x161   : > { %1271 = vmatmul.mubr.bf16.gmra.mrb[20].mxu0 %v776_v33  ;;  %1384 = vmatmul.mubr.bf16.gmra.mrb[20].mxu1 %v776_v33 }
 0x163   : > { %v1849_v38 = vpop.trf.xlu0 }
 0x164   : > { %v1853_v39 = vunpack.i.h.bf16 %v1849_v38  ;;  %v1850_v4 = vunpack.i.l.bf16 %v1849_v38 }
 0x166   : > { %v779_v40 = vpack.c.bf16 %v1850_v4, %v1845_v37  ;;  %v778_v41 = vpack.c.bf16 %v1853_v39, %v1848_v36 }
 0x167   : > { %v1854_v17 = vpop.trf.xlu0 }
 0x168   : > { %1280 = vmatprep.mubr.bf16.mxu0 %v779_v40  ;;  %1393 = vmatprep.mubr.bf16.mxu1 %v779_v40  ;;  %v1858_v42 = vunpack.i.h.bf16 %v1854_v17  ;;  %v1855_v9 = vunpack.i.l.bf16 %v1854_v17 }
 0x169   : > { %1281 = vmatmul.mubr.bf16.gmra.mrb[24].mxu0 %v778_v41  ;;  %1394 = vmatmul.mubr.bf16.gmra.mrb[24].mxu1 %v778_v41 }
 0x16b   : > { %v1859_v10 = vpop.trf.xlu0 }
 0x16c   : > { %v1863_v51 = vunpack.i.h.bf16 %v1859_v10  ;;  %v1860_v43 = vunpack.i.l.bf16 %v1859_v10 }
 0x16e   : > { %v781_v52 = vpack.c.bf16 %v1860_v43, %v1855_v9  ;;  %v780_v44 = vpack.c.bf16 %v1863_v51, %v1858_v42 }
 0x170   : > { %1290 = vmatprep.mubr.bf16.mxu0 %v781_v52  ;;  %1403 = vmatprep.mubr.bf16.mxu1 %v781_v52 }
 0x171   : > { %1291 = vmatmul.mubr.bf16.gmra.mrb[28].mxu0 %v780_v44  ;;  %1404 = vmatmul.mubr.bf16.gmra.mrb[28].mxu1 %v780_v44 }
 0x20c   : > { %v1222_v58 = vpop.f32.mrb[0].mxu0  ;;  %v1335_v59 = vpop.f32.mrb[0].mxu1 }
 0x20d   : > { %v1223_v60 = vadd.f32 %v1222_v58, %v2478_v55  ;;  %v1336_v34 = vadd.f32 %v1335_v59, %v2480_v0  ;;  %v1224_v61 = vpop.f32.mrb[1].mxu0  ;;  %v1337_v62 = vpop.f32.mrb[1].mxu1 }
 0x20e   : > { %v1225_v63 = vadd.f32 %v1224_v61, %v2482_v11  ;;  %v1338_v3 = vadd.f32 %v1337_v62, %v2484_v12  ;;  %v1226_v53 = vpop.f32.mrb[2].mxu0  ;;  %v1339_v56 = vpop.f32.mrb[2].mxu1 }
 0x20f   : > { %1414 = vst [vmem:[%s2490_s9] sm:$0xff] %v1223_v60  ;;  %1416 = vst [vmem:[%s2490_s9 + $0x10] sm:$0xff] %v1336_v34  ;;  %v1227_v5 = vadd.f32 %v1226_v53, %v2478_v55  ;;  %v1340_v6 = vadd.f32 %v1339_v56, %v2480_v0  ;;  %v1228_v7 = vpop.f32.mrb[3].mxu0  ;;  %v1341_v8 = vpop.f32.mrb[3].mxu1 }
 0x210   : > { %1415 = vst [vmem:[%s2490_s9 + $0x8] sm:$0xff] %v1225_v63  ;;  %1417 = vst [vmem:[%s2490_s9 + $0x18] sm:$0xff] %v1338_v3  ;;  %v1229_v22 = vadd.f32 %v1228_v7, %v2482_v11  ;;  %v1342_v13 = vadd.f32 %v1341_v8, %v2484_v12 }
 0x211   : > { %1418 = vst [vmem:[%s2490_s9 + $0x20] sm:$0xff] %v1227_v5  ;;  %1420 = vst [vmem:[%s2490_s9 + $0x30] sm:$0xff] %v1340_v6 }
 0x212   : > { %1419 = vst [vmem:[%s2490_s9 + $0x28] sm:$0xff] %v1229_v22  ;;  %1421 = vst [vmem:[%s2490_s9 + $0x38] sm:$0xff] %v1342_v13 }
 0x214   : > { %v1232_v2 = vpop.f32.mrb[4].mxu0  ;;  %v1345_v14 = vpop.f32.mrb[4].mxu1 }
 0x215   : > { %v1233_v1 = vadd.f32 %v1232_v2, %v2478_v55  ;;  %v1346_v15 = vadd.f32 %v1345_v14, %v2480_v0  ;;  %v1234_v16 = vpop.f32.mrb[5].mxu0  ;;  %v1347_v18 = vpop.f32.mrb[5].mxu1 }
 0x216   : > { %v1235_v57 = vadd.f32 %v1234_v16, %v2482_v11  ;;  %v1348_v19 = vadd.f32 %v1347_v18, %v2484_v12  ;;  %v1236_v23 = vpop.f32.mrb[6].mxu0  ;;  %v1349_v24 = vpop.f32.mrb[6].mxu1 }
 0x217   : > { %1422 = vst [vmem:[%s2490_s9 + $0x40] sm:$0xff] %v1233_v1  ;;  %1424 = vst [vmem:[%s2490_s9 + $0x50] sm:$0xff] %v1346_v15  ;;  %v1237_v25 = vadd.f32 %v1236_v23, %v2478_v55  ;;  %v1350_v26 = vadd.f32 %v1349_v24, %v2480_v0  ;;  %v1238_v27 = vpop.f32.mrb[7].mxu0  ;;  %v1351_v29 = vpop.f32.mrb[7].mxu1 }
 0x218   : > { %1423 = vst [vmem:[%s2490_s9 + $0x48] sm:$0xff] %v1235_v57  ;;  %1425 = vst [vmem:[%s2490_s9 + $0x58] sm:$0xff] %v1348_v19  ;;  %v1239_v31 = vadd.f32 %v1238_v27, %v2482_v11  ;;  %v1352_v28 = vadd.f32 %v1351_v29, %v2484_v12 }
 0x219   : > { %1426 = vst [vmem:[%s2490_s9 + $0x60] sm:$0xff] %v1237_v25  ;;  %1428 = vst [vmem:[%s2490_s9 + $0x70] sm:$0xff] %v1350_v26 }
 0x21a   : > { %1427 = vst [vmem:[%s2490_s9 + $0x68] sm:$0xff] %v1239_v31  ;;  %1429 = vst [vmem:[%s2490_s9 + $0x78] sm:$0xff] %v1352_v28 }
 0x21c   : > { %v1242_v30 = vpop.f32.mrb[8].mxu0  ;;  %v1355_v21 = vpop.f32.mrb[8].mxu1 }
 0x21d   : > { %v1243_v32 = vadd.f32 %v1242_v30, %v2478_v55  ;;  %v1356_v20 = vadd.f32 %v1355_v21, %v2480_v0  ;;  %v1244_v33 = vpop.f32.mrb[9].mxu0  ;;  %v1357_v35 = vpop.f32.mrb[9].mxu1 }
 0x21e   : > { %v1245_v36 = vadd.f32 %v1244_v33, %v2482_v11  ;;  %v1358_v37 = vadd.f32 %v1357_v35, %v2484_v12  ;;  %v1246_v38 = vpop.f32.mrb[10].mxu0  ;;  %v1359_v39 = vpop.f32.mrb[10].mxu1 }
 0x21f   : > { %1430 = vst [vmem:[%s2490_s9 + $0x80] sm:$0xff] %v1243_v32  ;;  %1432 = vst [vmem:[%s2490_s9 + $0x90] sm:$0xff] %v1356_v20  ;;  %v1247_v4 = vadd.f32 %v1246_v38, %v2478_v55  ;;  %v1360_v40 = vadd.f32 %v1359_v39, %v2480_v0  ;;  %v1248_v41 = vpop.f32.mrb[11].mxu0  ;;  %v1361_v17 = vpop.f32.mrb[11].mxu1 }
 0x220   : > { %1431 = vst [vmem:[%s2490_s9 + $0x88] sm:$0xff] %v1245_v36  ;;  %1433 = vst [vmem:[%s2490_s9 + $0x98] sm:$0xff] %v1358_v37  ;;  %v1249_v42 = vadd.f32 %v1248_v41, %v2482_v11  ;;  %v1362_v9 = vadd.f32 %v1361_v17, %v2484_v12 }
 0x221   : > { %1434 = vst [vmem:[%s2490_s9 + $0xa0] sm:$0xff] %v1247_v4  ;;  %1436 = vst [vmem:[%s2490_s9 + $0xb0] sm:$0xff] %v1360_v40 }
 0x222   : > { %1435 = vst [vmem:[%s2490_s9 + $0xa8] sm:$0xff] %v1249_v42  ;;  %1437 = vst [vmem:[%s2490_s9 + $0xb8] sm:$0xff] %v1362_v9 }
 0x224   : > { %v1252_v10 = vpop.f32.mrb[12].mxu0  ;;  %v1365_v51 = vpop.f32.mrb[12].mxu1 }
 0x225   : > { %v1253_v43 = vadd.f32 %v1252_v10, %v2478_v55  ;;  %v1366_v52 = vadd.f32 %v1365_v51, %v2480_v0  ;;  %v1254_v44 = vpop.f32.mrb[13].mxu0  ;;  %v1367_v45 = vpop.f32.mrb[13].mxu1 }
 0x226   : > { %v1255_v46 = vadd.f32 %v1254_v44, %v2482_v11  ;;  %v1368_v47 = vadd.f32 %v1367_v45, %v2484_v12  ;;  %v1256_v48 = vpop.f32.mrb[14].mxu0  ;;  %v1369_v49 = vpop.f32.mrb[14].mxu1 }
 0x227   : > { %1438 = vst [vmem:[%s2490_s9 + $0xc0] sm:$0xff] %v1253_v43  ;;  %1440 = vst [vmem:[%s2490_s9 + $0xd0] sm:$0xff] %v1366_v52  ;;  %v1257_v50 = vadd.f32 %v1256_v48, %v2478_v55  ;;  %v1370_v54 = vadd.f32 %v1369_v49, %v2480_v0  ;;  %v1258_v58 = vpop.f32.mrb[15].mxu0  ;;  %v1371_v59 = vpop.f32.mrb[15].mxu1 }
 0x228   : > { %1439 = vst [vmem:[%s2490_s9 + $0xc8] sm:$0xff] %v1255_v46  ;;  %1441 = vst [vmem:[%s2490_s9 + $0xd8] sm:$0xff] %v1368_v47  ;;  %v1259_v60 = vadd.f32 %v1258_v58, %v2482_v11  ;;  %v1372_v34 = vadd.f32 %v1371_v59, %v2484_v12 }
 0x229   : > { %1442 = vst [vmem:[%s2490_s9 + $0xe0] sm:$0xff] %v1257_v50  ;;  %1444 = vst [vmem:[%s2490_s9 + $0xf0] sm:$0xff] %v1370_v54 }
 0x22a   : > { %1443 = vst [vmem:[%s2490_s9 + $0xe8] sm:$0xff] %v1259_v60  ;;  %1445 = vst [vmem:[%s2490_s9 + $0xf8] sm:$0xff] %v1372_v34 }
 0x22c   : > { %v1262_v61 = vpop.f32.mrb[16].mxu0  ;;  %v1375_v62 = vpop.f32.mrb[16].mxu1 }
 0x22d   : > { %v1263_v63 = vadd.f32 %v1262_v61, %v2478_v55  ;;  %v1376_v3 = vadd.f32 %v1375_v62, %v2480_v0  ;;  %v1264_v53 = vpop.f32.mrb[17].mxu0  ;;  %v1377_v56 = vpop.f32.mrb[17].mxu1 }
 0x22e   : > { %v1265_v5 = vadd.f32 %v1264_v53, %v2482_v11  ;;  %v1378_v6 = vadd.f32 %v1377_v56, %v2484_v12  ;;  %v1266_v7 = vpop.f32.mrb[18].mxu0  ;;  %v1379_v8 = vpop.f32.mrb[18].mxu1 }
 0x22f   : > { %1446 = vst [vmem:[%s2490_s9 + $0x100] sm:$0xff] %v1263_v63  ;;  %1448 = vst [vmem:[%s2490_s9 + $0x110] sm:$0xff] %v1376_v3  ;;  %v1267_v22 = vadd.f32 %v1266_v7, %v2478_v55  ;;  %v1380_v13 = vadd.f32 %v1379_v8, %v2480_v0  ;;  %v1268_v2 = vpop.f32.mrb[19].mxu0  ;;  %v1381_v14 = vpop.f32.mrb[19].mxu1 }
 0x230   : > { %1447 = vst [vmem:[%s2490_s9 + $0x108] sm:$0xff] %v1265_v5  ;;  %1449 = vst [vmem:[%s2490_s9 + $0x118] sm:$0xff] %v1378_v6  ;;  %v1269_v1 = vadd.f32 %v1268_v2, %v2482_v11  ;;  %v1382_v15 = vadd.f32 %v1381_v14, %v2484_v12 }
 0x231   : > { %1450 = vst [vmem:[%s2490_s9 + $0x120] sm:$0xff] %v1267_v22  ;;  %1452 = vst [vmem:[%s2490_s9 + $0x130] sm:$0xff] %v1380_v13 }
 0x232   : > { %1451 = vst [vmem:[%s2490_s9 + $0x128] sm:$0xff] %v1269_v1  ;;  %1453 = vst [vmem:[%s2490_s9 + $0x138] sm:$0xff] %v1382_v15 }
 0x234   : > { %v1272_v16 = vpop.f32.mrb[20].mxu0  ;;  %v1385_v18 = vpop.f32.mrb[20].mxu1 }
 0x235   : > { %v1273_v57 = vadd.f32 %v1272_v16, %v2478_v55  ;;  %v1386_v19 = vadd.f32 %v1385_v18, %v2480_v0  ;;  %v1274_v23 = vpop.f32.mrb[21].mxu0  ;;  %v1387_v24 = vpop.f32.mrb[21].mxu1 }
 0x236   : > { %v1275_v25 = vadd.f32 %v1274_v23, %v2482_v11  ;;  %v1388_v26 = vadd.f32 %v1387_v24, %v2484_v12  ;;  %v1276_v27 = vpop.f32.mrb[22].mxu0  ;;  %v1389_v29 = vpop.f32.mrb[22].mxu1 }
 0x237   : > { %1454 = vst [vmem:[%s2490_s9 + $0x140] sm:$0xff] %v1273_v57  ;;  %1456 = vst [vmem:[%s2490_s9 + $0x150] sm:$0xff] %v1386_v19  ;;  %v1277_v31 = vadd.f32 %v1276_v27, %v2478_v55  ;;  %v1390_v28 = vadd.f32 %v1389_v29, %v2480_v0  ;;  %v1278_v30 = vpop.f32.mrb[23].mxu0  ;;  %v1391_v21 = vpop.f32.mrb[23].mxu1 }
 0x238   : > { %1455 = vst [vmem:[%s2490_s9 + $0x148] sm:$0xff] %v1275_v25  ;;  %1457 = vst [vmem:[%s2490_s9 + $0x158] sm:$0xff] %v1388_v26  ;;  %v1279_v32 = vadd.f32 %v1278_v30, %v2482_v11  ;;  %v1392_v20 = vadd.f32 %v1391_v21, %v2484_v12 }
 0x239   : > { %1458 = vst [vmem:[%s2490_s9 + $0x160] sm:$0xff] %v1277_v31  ;;  %1460 = vst [vmem:[%s2490_s9 + $0x170] sm:$0xff] %v1390_v28 }
 0x23a   : > { %1459 = vst [vmem:[%s2490_s9 + $0x168] sm:$0xff] %v1279_v32  ;;  %1461 = vst [vmem:[%s2490_s9 + $0x178] sm:$0xff] %v1392_v20 }
 0x23c   : > { %v1282_v33 = vpop.f32.mrb[24].mxu0  ;;  %v1395_v35 = vpop.f32.mrb[24].mxu1 }
 0x23d   : > { %v1283_v36 = vadd.f32 %v1282_v33, %v2478_v55  ;;  %v1396_v37 = vadd.f32 %v1395_v35, %v2480_v0  ;;  %v1284_v38 = vpop.f32.mrb[25].mxu0  ;;  %v1397_v39 = vpop.f32.mrb[25].mxu1 }
 0x23e   : > { %v1285_v4 = vadd.f32 %v1284_v38, %v2482_v11  ;;  %v1398_v40 = vadd.f32 %v1397_v39, %v2484_v12  ;;  %v1286_v41 = vpop.f32.mrb[26].mxu0  ;;  %v1399_v17 = vpop.f32.mrb[26].mxu1 }
 0x23f   : > { %1462 = vst [vmem:[%s2490_s9 + $0x180] sm:$0xff] %v1283_v36  ;;  %1464 = vst [vmem:[%s2490_s9 + $0x190] sm:$0xff] %v1396_v37  ;;  %v1287_v42 = vadd.f32 %v1286_v41, %v2478_v55  ;;  %v1400_v9 = vadd.f32 %v1399_v17, %v2480_v0  ;;  %v1288_v10 = vpop.f32.mrb[27].mxu0  ;;  %v1401_v51 = vpop.f32.mrb[27].mxu1 }
 0x240   : > { %1463 = vst [vmem:[%s2490_s9 + $0x188] sm:$0xff] %v1285_v4  ;;  %1465 = vst [vmem:[%s2490_s9 + $0x198] sm:$0xff] %v1398_v40  ;;  %v1289_v43 = vadd.f32 %v1288_v10, %v2482_v11  ;;  %v1402_v52 = vadd.f32 %v1401_v51, %v2484_v12 }
 0x241   : > { %1466 = vst [vmem:[%s2490_s9 + $0x1a0] sm:$0xff] %v1287_v42  ;;  %1468 = vst [vmem:[%s2490_s9 + $0x1b0] sm:$0xff] %v1400_v9 }
 0x242   : > { %1467 = vst [vmem:[%s2490_s9 + $0x1a8] sm:$0xff] %v1289_v43  ;;  %1469 = vst [vmem:[%s2490_s9 + $0x1b8] sm:$0xff] %v1402_v52 }
 0x244   : > { %v1292_v44 = vpop.f32.mrb[28].mxu0  ;;  %v1405_v45 = vpop.f32.mrb[28].mxu1 }
 0x245   : > { %v1293_v46 = vadd.f32 %v1292_v44, %v2478_v55  ;;  %v1406_v47 = vadd.f32 %v1405_v45, %v2480_v0  ;;  %v1294_v48 = vpop.f32.mrb[29].mxu0  ;;  %v1407_v49 = vpop.f32.mrb[29].mxu1 }
 0x246   : > { %v1295_v50 = vadd.f32 %v1294_v48, %v2482_v11  ;;  %v1408_v54 = vadd.f32 %v1407_v49, %v2484_v12  ;;  %v1296_v58 = vpop.f32.mrb[30].mxu0  ;;  %v1409_v59 = vpop.f32.mrb[30].mxu1 }
 0x247   : > { %1470 = vst [vmem:[%s2490_s9 + $0x1c0] sm:$0xff] %v1293_v46  ;;  %1472 = vst [vmem:[%s2490_s9 + $0x1d0] sm:$0xff] %v1406_v47  ;;  %v1297_v60 = vadd.f32 %v1296_v58, %v2478_v55  ;;  %v1410_v34 = vadd.f32 %v1409_v59, %v2480_v0  ;;  %v1298_v61 = vpop.f32.mrb[31].mxu0  ;;  %v1411_v62 = vpop.f32.mrb[31].mxu1 }
 0x248   : > { %1471 = vst [vmem:[%s2490_s9 + $0x1c8] sm:$0xff] %v1295_v50  ;;  %1473 = vst [vmem:[%s2490_s9 + $0x1d8] sm:$0xff] %v1408_v54  ;;  %v1299_v63 = vadd.f32 %v1298_v61, %v2482_v11  ;;  %v1412_v55 = vadd.f32 %v1411_v62, %v2484_v12 }
 0x249   : > { %1474 = vst [vmem:[%s2490_s9 + $0x1e0] sm:$0xff] %v1297_v60  ;;  %1476 = vst [vmem:[%s2490_s9 + $0x1f0] sm:$0xff] %v1410_v34 }
 0x24a   : > { %1475 = vst [vmem:[%s2490_s9 + $0x1e8] sm:$0xff] %v1299_v63  ;;  %1477 = vst [vmem:[%s2490_s9 + $0x1f8] sm:$0xff] %v1412_v55 }
 0x24b   : > { %2039 = shalt.err (!%p2036_p11)
}
 0x24c   : > { %s2040_s10 = scalar_lea.hbm %s2613_s30, 8192  ;;  %s2044_s20 = scalar_lea.hbm %s2669_s3, 24576 }
 0x24d   : > { %p2041_p13 = scmp.ne.s32.totalorder %s2613_s30, %s2040_s10  ;;  %p2045_p12 = scmp.lt.u32.totalorder %s2613_s30, %s2669_s3 }
 0x24e   : > { %p2046_p0 = scmp.lt.u32.totalorder %s2044_s20, %s2040_s10  ;;  %p2048_p7 = scmp.lt.u32.totalorder %s2040_s10, %s2613_s30 }
 0x24f   : > { %p2042_p2 = pnand %p2041_p13, %p2689_p9 }
 0x250   : > { %p2047_p4 = por %p2046_p0, %p2045_p12 }
 0x251   : > { %p2043_p6 = pneg %p2042_p2 }
 0x252   : > { %p2049_p10 = por %p2048_p7, %p2047_p4 }
 0x254   : > { %p2050_p1 = pnand %p2049_p10, %p2043_p6 }
 0x256   : > { %2053 = shalt.err (!%p2050_p1)
}
 0x257   : > { %s2112_s4 = smov 512   ;;  %s2113_s9 = smov 32  }
 0x258   : > { %1688 = dma.vmem_to_hbm [thread:$0]  (%p2689_p9), %s2615_s29, 8192, %s2613_s30, %s1479_s5, %s2112_s4, %s2112_s4, %s2113_s9  }
 0x259 PF: > { %p1705_p3 = scmp.ge.s32.totalorder %s2096_s15, 2  ;;  %s1508_s22 = sand.u32 1, %s2084_s12  }
 0x25a   : > { %p2690_p8 = scmp.ne.s32.totalorder %s2677_s25, 0  ;;  %s1509_s16 = scalar_lea.sflag [#allocation4], %s1508_s22 }
 0x25c   : > { %p1699_p5 = pnand %p1705_p3, %p2690_p8 }
 0x25e   : > { %2079 = dma.done.wait (!%p1699_p5), %s1509_s16, 8192  }
 0x25f   : > { %2081 = vsyncadd (!%p1699_p5), %s1509_s16, 4294959104  ;;  %p17_p11 = scmp.ge.s32.totalorder %s2159_s18, 5   ;;  %s2691_s12 = smov %s2088_s13 }
 0x260   : > { %s2692_s13 = smov %s2092_s14  ;;  %s2693_s14 = smov %s2171_s21 }
 0x261   : > { %s2694_s15 = smov %s2159_s18  ;;  %19 = sbr.rel (!%p17_p11) target bundleno = 6 (0x6), region = 81 }
 0x268   :  { %1514 = vsyncpa [#allocation3], 1 }
 0x269   :  { %1516 = vsyncpa [#allocation3 + $0x1], 1 }
 0x26a   :  { %1517 = vsyncpa [#allocation6], 1 }
 0x26b   :  { %1518 = vsyncpa [#allocation4], 1 }
 0x26c   :  { %1520 = vsyncpa [#allocation4 + $0x1], 1 }

</bundles_post_ra>
